<compile_context>
chip_gen: v7x
topology: tpu7x:2x2x1
jax: 0.10.0
libtpu: 0.0.40
codegen_flags: <defaults>
</compile_context>

<pallas_src>
import functools

import jax
import jax.numpy as jnp
from jax.experimental import pallas as pl
from jax.experimental.pallas import tpu as pltpu


# ---------------------------------------------------------------------------
# Fused kernel: full MoEAttn forward for one batch element per grid step
# ---------------------------------------------------------------------------

def _moe_attn_kernel(
    mask_ref,                                  # (1, 1, T2) f32: 1 valid / 0 masked
    x_ref, cn_mem_ref, en_mem_ref,             # (1,T1,D) bf16 / (1,T2,D) bf16 x2
    wq_cn_ref, bq_cn_ref, wk_cn_ref, bk_cn_ref,
    wv_cn_ref, bv_cn_ref, wo_cn_ref, bo_cn_ref,
    wq_en_ref, bq_en_ref, wk_en_ref, bk_en_ref,
    wv_en_ref, bv_en_ref, wo_en_ref, bo_en_ref,
    mix_w_cn_ref, mix_w_en_ref, mix_w_x_ref, mix_b_ref,   # (1,D) f32 x3, (1,1) f32
    o_ref,                                     # (1, T1, D) f32
    ctx_ref,                                   # VMEM scratch (T1, D) f32
    *, n_heads, approx_recip,
):
    D = x_ref.shape[2]
    dk = D // n_heads

    mask_f = mask_ref[0]                       # (1, T2) f32, 1 = valid key
    mask_bias = (mask_f - 1.0) * 1e30          # 0 valid / -1e30 masked

    x_b = x_ref[0]                             # (T1, D) bf16 (already low precision)

    def project(inp_b, w_ref, b_ref):
        # bf16 x bf16 matmul, f32 accumulate, bias add, immediate bf16 cast
        # (no f32 projection intermediate is kept resident).
        y = jnp.dot(inp_b, w_ref[...], preferred_element_type=jnp.float32)
        return (y + b_ref[...]).astype(jnp.bfloat16)

    def expert(mem_ref, wq_ref, bq_ref, wk_ref, bk_ref, wv_ref, bv_ref,
               wo_ref, bo_ref):
        mem_b = mem_ref[0]                     # (T2, D) bf16, no in-kernel cast
        q = project(x_b, wq_ref, bq_ref)       # (T1, D); 1/sqrt(dk) folded in
        k = project(mem_b, wk_ref, bk_ref)     # (T2, D)
        v = project(mem_b, wv_ref, bv_ref)     # (T2, D)

        for h in range(n_heads):               # static unroll, H small
            sl = slice(h * dk, (h + 1) * dk)
            s = jax.lax.dot_general(           # (T1, T2) f32, q @ k^T
                q[:, sl], k[:, sl], (((1,), (1,)), ((), ())),
                preferred_element_type=jnp.float32)
            s = s + mask_bias                  # additive mask bias
            m = jnp.max(s, axis=-1, keepdims=True)
            p = jnp.exp(s - m)
            l = jnp.sum(p, axis=-1, keepdims=True)
            if approx_recip:
                p = p * pl.reciprocal(l, approx=True)   # EUP reciprocal
            else:
                p = p / l                      # exact fallback for parity tests
            p = p * mask_f                     # ESPnet: zero masked columns
            # Static lane-slice store into scratch (replaces jnp.concatenate).
            ctx_ref[:, sl] = jnp.dot(p.astype(jnp.bfloat16), v[:, sl],
                                     preferred_element_type=jnp.float32)

        out = jnp.dot(ctx_ref[...].astype(jnp.bfloat16), wo_ref[...],
                      preferred_element_type=jnp.float32)
        return out + bo_ref[...]               # (T1, D) f32

    cn_c = expert(cn_mem_ref, wq_cn_ref, bq_cn_ref, wk_cn_ref, bk_cn_ref,
                  wv_cn_ref, bv_cn_ref, wo_cn_ref, bo_cn_ref)
    en_c = expert(en_mem_ref, wq_en_ref, bq_en_ref, wk_en_ref, bk_en_ref,
                  wv_en_ref, bv_en_ref, wo_en_ref, bo_en_ref)

    # Linear mixer: sigmoid(cat(cn, en, x) @ W + b) as VPU mul + lane reduce.
    # Mixer weight arrives pre-split into its three (1, D) chunks.
    x_f = x_b.astype(jnp.float32)
    logit = jnp.sum(cn_c * mix_w_cn_ref[...]
                    + en_c * mix_w_en_ref[...]
                    + x_f * mix_w_x_ref[...],
                    axis=-1, keepdims=True) + mix_b_ref[...]     # (T1, 1)
    lam = jax.nn.sigmoid(logit)
    o_ref[0] = (lam * cn_c + (1.0 - lam) * en_c).astype(o_ref.dtype)


# ---------------------------------------------------------------------------
# Wrapper
# ---------------------------------------------------------------------------

def moe_attn_forward(x, cn_memory, en_memory, memory_mask, params, n_heads,
                     *, matmul_dtype=jnp.bfloat16, approx_recip=True,
                     vmem_limit_bytes=48 * 1024 * 1024):
    """MoEAttn.forward, mode='linear'. x: (B,T1,D); memories: (B,T2,D);
    memory_mask: (B,1,T2) bool (True = valid key)."""
    B, T1, D = x.shape
    T2 = cn_memory.shape[1]

    # Low-precision activations in HBM: halves the dominant (T2, D) DMA.
    x_lp = x.astype(matmul_dtype)
    cn_lp = cn_memory.astype(matmul_dtype)
    en_lp = en_memory.astype(matmul_dtype)
    mask_f = memory_mask.astype(jnp.float32)       # (B, 1, T2), 1 = valid

    kernel = functools.partial(_moe_attn_kernel, n_heads=n_heads,
                               approx_recip=approx_recip)

    def per_batch(d1, d2):
        return pl.BlockSpec((1, d1, d2), lambda b: (b, 0, 0))

    def resident_vmem():
        # Whole array resident in VMEM, single-buffered: weights never change
        # across the batch grid, so no pipelining / double-buffering needed.
        return pl.BlockSpec(memory_space=pltpu.MemorySpace.VMEM)

    weight_order = [
        "wq_cn", "bq_cn", "wk_cn", "bk_cn", "wv_cn", "bv_cn", "wo_cn", "bo_cn",
        "wq_en", "bq_en", "wk_en", "bk_en", "wv_en", "bv_en", "wo_en", "bo_en",
        "mix_w_cn", "mix_w_en", "mix_w_x", "mix_b",
    ]
    weight_args = [params[k] for k in weight_order]

    grid_spec = pltpu.PrefetchScalarGridSpec(
        num_scalar_prefetch=0,
        grid=(B,),
        in_specs=[
            per_batch(1, T2),            # mask (f32 0/1)
            per_batch(T1, D),            # x (bf16)
            per_batch(T2, D),            # cn_memory (bf16)
            per_batch(T2, D),            # en_memory (bf16)
        ] + [resident_vmem() for _ in weight_args],
        out_specs=per_batch(T1, D),
        scratch_shapes=[pltpu.VMEM((T1, D), jnp.float32)],   # per-expert ctx
    )

    return pl.pallas_call(
        kernel,
        out_shape=jax.ShapeDtypeStruct((B, T1, D), x.dtype),
        grid_spec=grid_spec,
        compiler_params=pltpu.CompilerParams(
            dimension_semantics=("parallel",),
            vmem_limit_bytes=vmem_limit_bytes),
    )(mask_f, x_lp, cn_lp, en_lp, *weight_args)


# ---------------------------------------------------------------------------
# Deterministic parameter init (separate per-linear weights, scale folded)
# ---------------------------------------------------------------------------

def init_params(key, size, n_heads, matmul_dtype=jnp.bfloat16):
    dk = size // n_heads
    scale = 1.0 / (dk ** 0.5)

    def lin(k, d_in, d_out, s=0.05):
        kw, kb = jax.random.split(k)
        w = s * jax.random.normal(kw, (d_in, d_out), jnp.float32)
        b = s * jax.random.normal(kb, (1, d_out), jnp.float32)
        return w, b

    keys = jax.random.split(key, 9)

    def mha(ks):
        wq, bq = lin(ks[0], size, size)
        wk, bk = lin(ks[1], size, size)
        wv, bv = lin(ks[2], size, size)
        wo, bo = lin(ks[3], size, size)
        return wq, bq, wk, bk, wv, bv, wo, bo

    wq_c, bq_c, wk_c, bk_c, wv_c, bv_c, wo_c, bo_c = mha(keys[0:4])
    wq_e, bq_e, wk_e, bk_e, wv_e, bv_e, wo_e, bo_e = mha(keys[4:8])

    # linear_mixer: nn.Linear(3*size, 1); keep concat order (cn, en, x).
    w_mix, b_mix = lin(keys[8], 3 * size, 1)       # (3*size, 1), (1, 1)

    def w(a):
        return a.astype(matmul_dtype)

    return {
        # 1/sqrt(dk) folded into the q projection (weight AND bias).
        "wq_cn": w(wq_c * scale), "bq_cn": bq_c * scale,
        "wk_cn": w(wk_c), "bk_cn": bk_c,
        "wv_cn": w(wv_c), "bv_cn": bv_c,
        "wo_cn": w(wo_c), "bo_cn": bo_c,
        "wq_en": w(wq_e * scale), "bq_en": bq_e * scale,
        "wk_en": w(wk_e), "bk_en": bk_e,
        "wv_en": w(wv_e), "bv_en": bv_e,
        "wo_en": w(wo_e), "bo_en": bo_e,
        # Mixer weight pre-split along the concat axis -> no in-kernel lane slicing.
        "mix_w_cn": w_mix[:size].T,                # (1, size) f32
        "mix_w_en": w_mix[size:2 * size].T,        # (1, size) f32
        "mix_w_x":  w_mix[2 * size:].T,            # (1, size) f32
        "mix_b":    b_mix.reshape(1, 1),           # (1, 1) f32
    }


# ---------------------------------------------------------------------------
# Main
# ---------------------------------------------------------------------------

if __name__ == "__main__":
    B, T1, T2 = 2, 8, 16
    size, n_heads = 32, 4

    key = jax.random.PRNGKey(0)
    k_x, k_cn, k_en, k_p = jax.random.split(key, 4)

    x = jax.random.normal(k_x, (B, T1, size), jnp.float32)
    cn_memory = jax.random.normal(k_cn, (B, T2, size), jnp.float32)
    en_memory = jax.random.normal(k_en, (B, T2, size), jnp.float32)

    # boolean mask (B, 1, T2): True = valid key position
    lengths = jnp.array([T2, T2 - 4], dtype=jnp.int32)
    memory_mask = (jnp.arange(T2)[None, None, :] < lengths[:, None, None])

    params = init_params(k_p, size, n_heads)

    fwd = jax.jit(functools.partial(moe_attn_forward, n_heads=n_heads))
    out = fwd(x, cn_memory, en_memory, memory_mask, params)
    out = jax.block_until_ready(out)

    assert out.shape == (B, T1, size)
    assert out.dtype == jnp.float32
    assert bool(jnp.all(jnp.isfinite(out)))
    print("KERNEL_OK")
</pallas_src>

<mosaic_0001>
module attributes {stable_mosaic.version = 11 : i64} {
  func.func @_moe_attn_kernel(%arg0: i32, %arg1: memref<1x1x16xf32, #tpu.memory_space<vmem>>, %arg2: memref<1x8x32xbf16, #tpu.memory_space<vmem>>, %arg3: memref<1x16x32xbf16, #tpu.memory_space<vmem>>, %arg4: memref<1x16x32xbf16, #tpu.memory_space<vmem>>, %arg5: memref<32x32xbf16, #tpu.memory_space<vmem>>, %arg6: memref<1x32xf32, #tpu.memory_space<vmem>>, %arg7: memref<32x32xbf16, #tpu.memory_space<vmem>>, %arg8: memref<1x32xf32, #tpu.memory_space<vmem>>, %arg9: memref<32x32xbf16, #tpu.memory_space<vmem>>, %arg10: memref<1x32xf32, #tpu.memory_space<vmem>>, %arg11: memref<32x32xbf16, #tpu.memory_space<vmem>>, %arg12: memref<1x32xf32, #tpu.memory_space<vmem>>, %arg13: memref<32x32xbf16, #tpu.memory_space<vmem>>, %arg14: memref<1x32xf32, #tpu.memory_space<vmem>>, %arg15: memref<32x32xbf16, #tpu.memory_space<vmem>>, %arg16: memref<1x32xf32, #tpu.memory_space<vmem>>, %arg17: memref<32x32xbf16, #tpu.memory_space<vmem>>, %arg18: memref<1x32xf32, #tpu.memory_space<vmem>>, %arg19: memref<32x32xbf16, #tpu.memory_space<vmem>>, %arg20: memref<1x32xf32, #tpu.memory_space<vmem>>, %arg21: memref<1x32xf32, #tpu.memory_space<vmem>>, %arg22: memref<1x32xf32, #tpu.memory_space<vmem>>, %arg23: memref<1x32xf32, #tpu.memory_space<vmem>>, %arg24: memref<1x1xf32, #tpu.memory_space<vmem>>, %arg25: memref<1x8x32xf32, #tpu.memory_space<vmem>>, %arg26: memref<8x32xf32, #tpu.memory_space<vmem>>) attributes {dimension_semantics = [#tpu.dimension_semantics<parallel>], iteration_bounds = array<i64: 2>, scalar_prefetch = 0 : i64, scratch_operands = 1 : i64, tpu.core_type = #tpu.core_type<tc>, window_params = [{transform_indices = @transform_0, window_bounds = array<i64: 1, 1, 16>}, {transform_indices = @transform_1, window_bounds = array<i64: 1, 8, 32>}, {transform_indices = @transform_2, window_bounds = array<i64: 1, 16, 32>}, {transform_indices = @transform_3, window_bounds = array<i64: 1, 16, 32>}, {pipeline_mode = #tpu.pipeline_mode<synchronous>, transform_indices = @transform_4, window_bounds = array<i64: 32, 32>}, {pipeline_mode = #tpu.pipeline_mode<synchronous>, transform_indices = @transform_5, window_bounds = array<i64: 1, 32>}, {pipeline_mode = #tpu.pipeline_mode<synchronous>, transform_indices = @transform_6, window_bounds = array<i64: 32, 32>}, {pipeline_mode = #tpu.pipeline_mode<synchronous>, transform_indices = @transform_7, window_bounds = array<i64: 1, 32>}, {pipeline_mode = #tpu.pipeline_mode<synchronous>, transform_indices = @transform_8, window_bounds = array<i64: 32, 32>}, {pipeline_mode = #tpu.pipeline_mode<synchronous>, transform_indices = @transform_9, window_bounds = array<i64: 1, 32>}, {pipeline_mode = #tpu.pipeline_mode<synchronous>, transform_indices = @transform_10, window_bounds = array<i64: 32, 32>}, {pipeline_mode = #tpu.pipeline_mode<synchronous>, transform_indices = @transform_11, window_bounds = array<i64: 1, 32>}, {pipeline_mode = #tpu.pipeline_mode<synchronous>, transform_indices = @transform_12, window_bounds = array<i64: 32, 32>}, {pipeline_mode = #tpu.pipeline_mode<synchronous>, transform_indices = @transform_13, window_bounds = array<i64: 1, 32>}, {pipeline_mode = #tpu.pipeline_mode<synchronous>, transform_indices = @transform_14, window_bounds = array<i64: 32, 32>}, {pipeline_mode = #tpu.pipeline_mode<synchronous>, transform_indices = @transform_15, window_bounds = array<i64: 1, 32>}, {pipeline_mode = #tpu.pipeline_mode<synchronous>, transform_indices = @transform_16, window_bounds = array<i64: 32, 32>}, {pipeline_mode = #tpu.pipeline_mode<synchronous>, transform_indices = @transform_17, window_bounds = array<i64: 1, 32>}, {pipeline_mode = #tpu.pipeline_mode<synchronous>, transform_indices = @transform_18, window_bounds = array<i64: 32, 32>}, {pipeline_mode = #tpu.pipeline_mode<synchronous>, transform_indices = @transform_19, window_bounds = array<i64: 1, 32>}, {pipeline_mode = #tpu.pipeline_mode<synchronous>, transform_indices = @transform_20, window_bounds = array<i64: 1, 32>}, {pipeline_mode = #tpu.pipeline_mode<synchronous>, transform_indices = @transform_21, window_bounds = array<i64: 1, 32>}, {pipeline_mode = #tpu.pipeline_mode<synchronous>, transform_indices = @transform_22, window_bounds = array<i64: 1, 32>}, {pipeline_mode = #tpu.pipeline_mode<synchronous>, transform_indices = @transform_23, window_bounds = array<i64: 1, 1>}, {transform_indices = @transform_24, window_bounds = array<i64: 1, 8, 32>}]} {
    %c0 = arith.constant 0 : index
    %c0_0 = arith.constant 0 : index
    %c0_1 = arith.constant 0 : index
    %0 = vector.load %arg1[%c0, %c0_0, %c0_1] : memref<1x1x16xf32, #tpu.memory_space<vmem>>, vector<1x1x16xf32>
    %1 = vector.shape_cast %0 : vector<1x1x16xf32> to vector<1x16xf32>
    %cst = arith.constant 1.000000e+00 : f32
    %2 = vector.broadcast %cst : f32 to vector<1x16xf32>
    %3 = arith.subf %1, %2 : vector<1x16xf32>
    %cst_2 = arith.constant 1.000000e+30 : f32
    %4 = vector.broadcast %cst_2 : f32 to vector<1x16xf32>
    %5 = arith.mulf %3, %4 : vector<1x16xf32>
    %c0_3 = arith.constant 0 : index
    %c0_4 = arith.constant 0 : index
    %c0_5 = arith.constant 0 : index
    %6 = vector.load %arg2[%c0_3, %c0_4, %c0_5] : memref<1x8x32xbf16, #tpu.memory_space<vmem>>, vector<1x8x32xbf16>
    %7 = vector.shape_cast %6 : vector<1x8x32xbf16> to vector<8x32xbf16>
    %c0_6 = arith.constant 0 : index
    %c0_7 = arith.constant 0 : index
    %c0_8 = arith.constant 0 : index
    %8 = vector.load %arg3[%c0_6, %c0_7, %c0_8] : memref<1x16x32xbf16, #tpu.memory_space<vmem>>, vector<1x16x32xbf16>
    %9 = vector.shape_cast %8 : vector<1x16x32xbf16> to vector<16x32xbf16>
    %c0_9 = arith.constant 0 : index
    %c0_10 = arith.constant 0 : index
    %10 = vector.load %arg5[%c0_9, %c0_10] : memref<32x32xbf16, #tpu.memory_space<vmem>>, vector<32x32xbf16>
    %cst_11 = arith.constant dense<0.000000e+00> : vector<8x32xf32>
    %11 = tpu.matmul %7, %10, %cst_11 {dimension_numbers = #tpu.dot_dimension_numbers<[1], [0], [0], [1], [0, 0, 1, 1], [], []>} : vector<8x32xbf16>, vector<32x32xbf16>, vector<8x32xf32> -> vector<8x32xf32>
    %c0_12 = arith.constant 0 : index
    %c0_13 = arith.constant 0 : index
    %12 = vector.load %arg6[%c0_12, %c0_13] : memref<1x32xf32, #tpu.memory_space<vmem>>, vector<1x32xf32>
    %13 = vector.broadcast %12 : vector<1x32xf32> to vector<8x32xf32>
    %14 = arith.addf %11, %13 : vector<8x32xf32>
    %15 = arith.truncf %14 : vector<8x32xf32> to vector<8x32xbf16>
    %c0_14 = arith.constant 0 : index
    %c0_15 = arith.constant 0 : index
    %16 = vector.load %arg7[%c0_14, %c0_15] : memref<32x32xbf16, #tpu.memory_space<vmem>>, vector<32x32xbf16>
    %cst_16 = arith.constant dense<0.000000e+00> : vector<16x32xf32>
    %17 = tpu.matmul %9, %16, %cst_16 {dimension_numbers = #tpu.dot_dimension_numbers<[1], [0], [0], [1], [0, 0, 1, 1], [], []>} : vector<16x32xbf16>, vector<32x32xbf16>, vector<16x32xf32> -> vector<16x32xf32>
    %c0_17 = arith.constant 0 : index
    %c0_18 = arith.constant 0 : index
    %18 = vector.load %arg8[%c0_17, %c0_18] : memref<1x32xf32, #tpu.memory_space<vmem>>, vector<1x32xf32>
    %19 = vector.broadcast %18 : vector<1x32xf32> to vector<16x32xf32>
    %20 = arith.addf %17, %19 : vector<16x32xf32>
    %21 = arith.truncf %20 : vector<16x32xf32> to vector<16x32xbf16>
    %c0_19 = arith.constant 0 : index
    %c0_20 = arith.constant 0 : index
    %22 = vector.load %arg9[%c0_19, %c0_20] : memref<32x32xbf16, #tpu.memory_space<vmem>>, vector<32x32xbf16>
    %cst_21 = arith.constant dense<0.000000e+00> : vector<16x32xf32>
    %23 = tpu.matmul %9, %22, %cst_21 {dimension_numbers = #tpu.dot_dimension_numbers<[1], [0], [0], [1], [0, 0, 1, 1], [], []>} : vector<16x32xbf16>, vector<32x32xbf16>, vector<16x32xf32> -> vector<16x32xf32>
    %c0_22 = arith.constant 0 : index
    %c0_23 = arith.constant 0 : index
    %24 = vector.load %arg10[%c0_22, %c0_23] : memref<1x32xf32, #tpu.memory_space<vmem>>, vector<1x32xf32>
    %25 = vector.broadcast %24 : vector<1x32xf32> to vector<16x32xf32>
    %26 = arith.addf %23, %25 : vector<16x32xf32>
    %27 = arith.truncf %26 : vector<16x32xf32> to vector<16x32xbf16>
    %28 = vector.extract_strided_slice %15 {offsets = [0, 0], sizes = [8, 8], strides = [1, 1]} : vector<8x32xbf16> to vector<8x8xbf16>
    %29 = vector.extract_strided_slice %21 {offsets = [0, 0], sizes = [16, 8], strides = [1, 1]} : vector<16x32xbf16> to vector<16x8xbf16>
    %cst_24 = arith.constant dense<0.000000e+00> : vector<8x16xf32>
    %30 = tpu.matmul %28, %29, %cst_24 {dimension_numbers = #tpu.dot_dimension_numbers<[1], [1], [0], [0], [0, 0, 1, 0], [], []>} : vector<8x8xbf16>, vector<16x8xbf16>, vector<8x16xf32> -> vector<8x16xf32>
    %31 = vector.broadcast %5 : vector<1x16xf32> to vector<8x16xf32>
    %32 = arith.addf %30, %31 : vector<8x16xf32>
    %cst_25 = arith.constant dense<0xFF800000> : vector<8xf32>
    %33 = vector.multi_reduction <maximumf>, %32, %cst_25 [1] : vector<8x16xf32> to vector<8xf32>
    %34 = vector.shape_cast %33 : vector<8xf32> to vector<8x1xf32>
    %35 = vector.broadcast %34 : vector<8x1xf32> to vector<8x16xf32>
    %36 = arith.subf %32, %35 : vector<8x16xf32>
    %37 = math.exp %36 : vector<8x16xf32>
    %cst_26 = arith.constant dense<0.000000e+00> : vector<8xf32>
    %38 = vector.multi_reduction <add>, %37, %cst_26 [1] : vector<8x16xf32> to vector<8xf32>
    %39 = vector.shape_cast %38 : vector<8xf32> to vector<8x1xf32>
    %40 = tpu.reciprocal %39 {approx = true} : vector<8x1xf32> -> vector<8x1xf32>
    %41 = vector.broadcast %40 : vector<8x1xf32> to vector<8x16xf32>
    %42 = arith.mulf %37, %41 : vector<8x16xf32>
    %43 = vector.broadcast %1 : vector<1x16xf32> to vector<8x16xf32>
    %44 = arith.mulf %42, %43 : vector<8x16xf32>
    %45 = arith.truncf %44 : vector<8x16xf32> to vector<8x16xbf16>
    %46 = vector.extract_strided_slice %27 {offsets = [0, 0], sizes = [16, 8], strides = [1, 1]} : vector<16x32xbf16> to vector<16x8xbf16>
    %cst_27 = arith.constant dense<0.000000e+00> : vector<8x8xf32>
    %47 = tpu.matmul %45, %46, %cst_27 {dimension_numbers = #tpu.dot_dimension_numbers<[1], [0], [0], [1], [0, 0, 1, 1], [], []>} : vector<8x16xbf16>, vector<16x8xbf16>, vector<8x8xf32> -> vector<8x8xf32>
    %c0_28 = arith.constant 0 : index
    %c0_29 = arith.constant 0 : index
    %48 = vector.load %arg26[%c0_28, %c0_29] : memref<8x32xf32, #tpu.memory_space<vmem>>, vector<8x8xf32>
    tpu.vector_store %arg26[%c0_28, %c0_29], %47 {strides = array<i32>} : memref<8x32xf32, #tpu.memory_space<vmem>>, vector<8x8xf32>,
    %49 = vector.extract_strided_slice %15 {offsets = [0, 8], sizes = [8, 8], strides = [1, 1]} : vector<8x32xbf16> to vector<8x8xbf16>
    %50 = vector.extract_strided_slice %21 {offsets = [0, 8], sizes = [16, 8], strides = [1, 1]} : vector<16x32xbf16> to vector<16x8xbf16>
    %cst_30 = arith.constant dense<0.000000e+00> : vector<8x16xf32>
    %51 = tpu.matmul %49, %50, %cst_30 {dimension_numbers = #tpu.dot_dimension_numbers<[1], [1], [0], [0], [0, 0, 1, 0], [], []>} : vector<8x8xbf16>, vector<16x8xbf16>, vector<8x16xf32> -> vector<8x16xf32>
    %52 = vector.broadcast %5 : vector<1x16xf32> to vector<8x16xf32>
    %53 = arith.addf %51, %52 : vector<8x16xf32>
    %cst_31 = arith.constant dense<0xFF800000> : vector<8xf32>
    %54 = vector.multi_reduction <maximumf>, %53, %cst_31 [1] : vector<8x16xf32> to vector<8xf32>
    %55 = vector.shape_cast %54 : vector<8xf32> to vector<8x1xf32>
    %56 = vector.broadcast %55 : vector<8x1xf32> to vector<8x16xf32>
    %57 = arith.subf %53, %56 : vector<8x16xf32>
    %58 = math.exp %57 : vector<8x16xf32>
    %cst_32 = arith.constant dense<0.000000e+00> : vector<8xf32>
    %59 = vector.multi_reduction <add>, %58, %cst_32 [1] : vector<8x16xf32> to vector<8xf32>
    %60 = vector.shape_cast %59 : vector<8xf32> to vector<8x1xf32>
    %61 = tpu.reciprocal %60 {approx = true} : vector<8x1xf32> -> vector<8x1xf32>
    %62 = vector.broadcast %61 : vector<8x1xf32> to vector<8x16xf32>
    %63 = arith.mulf %58, %62 : vector<8x16xf32>
    %64 = vector.broadcast %1 : vector<1x16xf32> to vector<8x16xf32>
    %65 = arith.mulf %63, %64 : vector<8x16xf32>
    %66 = arith.truncf %65 : vector<8x16xf32> to vector<8x16xbf16>
    %67 = vector.extract_strided_slice %27 {offsets = [0, 8], sizes = [16, 8], strides = [1, 1]} : vector<16x32xbf16> to vector<16x8xbf16>
    %cst_33 = arith.constant dense<0.000000e+00> : vector<8x8xf32>
    %68 = tpu.matmul %66, %67, %cst_33 {dimension_numbers = #tpu.dot_dimension_numbers<[1], [0], [0], [1], [0, 0, 1, 1], [], []>} : vector<8x16xbf16>, vector<16x8xbf16>, vector<8x8xf32> -> vector<8x8xf32>
    %c0_34 = arith.constant 0 : index
    %c8 = arith.constant 8 : index
    %69 = vector.load %arg26[%c0_34, %c8] : memref<8x32xf32, #tpu.memory_space<vmem>>, vector<8x8xf32>
    tpu.vector_store %arg26[%c0_34, %c8], %68 {strides = array<i32>} : memref<8x32xf32, #tpu.memory_space<vmem>>, vector<8x8xf32>,
    %70 = vector.extract_strided_slice %15 {offsets = [0, 16], sizes = [8, 8], strides = [1, 1]} : vector<8x32xbf16> to vector<8x8xbf16>
    %71 = vector.extract_strided_slice %21 {offsets = [0, 16], sizes = [16, 8], strides = [1, 1]} : vector<16x32xbf16> to vector<16x8xbf16>
    %cst_35 = arith.constant dense<0.000000e+00> : vector<8x16xf32>
    %72 = tpu.matmul %70, %71, %cst_35 {dimension_numbers = #tpu.dot_dimension_numbers<[1], [1], [0], [0], [0, 0, 1, 0], [], []>} : vector<8x8xbf16>, vector<16x8xbf16>, vector<8x16xf32> -> vector<8x16xf32>
    %73 = vector.broadcast %5 : vector<1x16xf32> to vector<8x16xf32>
    %74 = arith.addf %72, %73 : vector<8x16xf32>
    %cst_36 = arith.constant dense<0xFF800000> : vector<8xf32>
    %75 = vector.multi_reduction <maximumf>, %74, %cst_36 [1] : vector<8x16xf32> to vector<8xf32>
    %76 = vector.shape_cast %75 : vector<8xf32> to vector<8x1xf32>
    %77 = vector.broadcast %76 : vector<8x1xf32> to vector<8x16xf32>
    %78 = arith.subf %74, %77 : vector<8x16xf32>
    %79 = math.exp %78 : vector<8x16xf32>
    %cst_37 = arith.constant dense<0.000000e+00> : vector<8xf32>
    %80 = vector.multi_reduction <add>, %79, %cst_37 [1] : vector<8x16xf32> to vector<8xf32>
    %81 = vector.shape_cast %80 : vector<8xf32> to vector<8x1xf32>
    %82 = tpu.reciprocal %81 {approx = true} : vector<8x1xf32> -> vector<8x1xf32>
    %83 = vector.broadcast %82 : vector<8x1xf32> to vector<8x16xf32>
    %84 = arith.mulf %79, %83 : vector<8x16xf32>
    %85 = vector.broadcast %1 : vector<1x16xf32> to vector<8x16xf32>
    %86 = arith.mulf %84, %85 : vector<8x16xf32>
    %87 = arith.truncf %86 : vector<8x16xf32> to vector<8x16xbf16>
    %88 = vector.extract_strided_slice %27 {offsets = [0, 16], sizes = [16, 8], strides = [1, 1]} : vector<16x32xbf16> to vector<16x8xbf16>
    %cst_38 = arith.constant dense<0.000000e+00> : vector<8x8xf32>
    %89 = tpu.matmul %87, %88, %cst_38 {dimension_numbers = #tpu.dot_dimension_numbers<[1], [0], [0], [1], [0, 0, 1, 1], [], []>} : vector<8x16xbf16>, vector<16x8xbf16>, vector<8x8xf32> -> vector<8x8xf32>
    %c0_39 = arith.constant 0 : index
    %c16 = arith.constant 16 : index
    %90 = vector.load %arg26[%c0_39, %c16] : memref<8x32xf32, #tpu.memory_space<vmem>>, vector<8x8xf32>
    tpu.vector_store %arg26[%c0_39, %c16], %89 {strides = array<i32>} : memref<8x32xf32, #tpu.memory_space<vmem>>, vector<8x8xf32>,
    %91 = vector.extract_strided_slice %15 {offsets = [0, 24], sizes = [8, 8], strides = [1, 1]} : vector<8x32xbf16> to vector<8x8xbf16>
    %92 = vector.extract_strided_slice %21 {offsets = [0, 24], sizes = [16, 8], strides = [1, 1]} : vector<16x32xbf16> to vector<16x8xbf16>
    %cst_40 = arith.constant dense<0.000000e+00> : vector<8x16xf32>
    %93 = tpu.matmul %91, %92, %cst_40 {dimension_numbers = #tpu.dot_dimension_numbers<[1], [1], [0], [0], [0, 0, 1, 0], [], []>} : vector<8x8xbf16>, vector<16x8xbf16>, vector<8x16xf32> -> vector<8x16xf32>
    %94 = vector.broadcast %5 : vector<1x16xf32> to vector<8x16xf32>
    %95 = arith.addf %93, %94 : vector<8x16xf32>
    %cst_41 = arith.constant dense<0xFF800000> : vector<8xf32>
    %96 = vector.multi_reduction <maximumf>, %95, %cst_41 [1] : vector<8x16xf32> to vector<8xf32>
    %97 = vector.shape_cast %96 : vector<8xf32> to vector<8x1xf32>
    %98 = vector.broadcast %97 : vector<8x1xf32> to vector<8x16xf32>
    %99 = arith.subf %95, %98 : vector<8x16xf32>
    %100 = math.exp %99 : vector<8x16xf32>
    %cst_42 = arith.constant dense<0.000000e+00> : vector<8xf32>
    %101 = vector.multi_reduction <add>, %100, %cst_42 [1] : vector<8x16xf32> to vector<8xf32>
    %102 = vector.shape_cast %101 : vector<8xf32> to vector<8x1xf32>
    %103 = tpu.reciprocal %102 {approx = true} : vector<8x1xf32> -> vector<8x1xf32>
    %104 = vector.broadcast %103 : vector<8x1xf32> to vector<8x16xf32>
    %105 = arith.mulf %100, %104 : vector<8x16xf32>
    %106 = vector.broadcast %1 : vector<1x16xf32> to vector<8x16xf32>
    %107 = arith.mulf %105, %106 : vector<8x16xf32>
    %108 = arith.truncf %107 : vector<8x16xf32> to vector<8x16xbf16>
    %109 = vector.extract_strided_slice %27 {offsets = [0, 24], sizes = [16, 8], strides = [1, 1]} : vector<16x32xbf16> to vector<16x8xbf16>
    %cst_43 = arith.constant dense<0.000000e+00> : vector<8x8xf32>
    %110 = tpu.matmul %108, %109, %cst_43 {dimension_numbers = #tpu.dot_dimension_numbers<[1], [0], [0], [1], [0, 0, 1, 1], [], []>} : vector<8x16xbf16>, vector<16x8xbf16>, vector<8x8xf32> -> vector<8x8xf32>
    %c0_44 = arith.constant 0 : index
    %c24 = arith.constant 24 : index
    %111 = vector.load %arg26[%c0_44, %c24] : memref<8x32xf32, #tpu.memory_space<vmem>>, vector<8x8xf32>
    tpu.vector_store %arg26[%c0_44, %c24], %110 {strides = array<i32>} : memref<8x32xf32, #tpu.memory_space<vmem>>, vector<8x8xf32>,
    %c0_45 = arith.constant 0 : index
    %c0_46 = arith.constant 0 : index
    %112 = vector.load %arg26[%c0_45, %c0_46] : memref<8x32xf32, #tpu.memory_space<vmem>>, vector<8x32xf32>
    %113 = arith.truncf %112 : vector<8x32xf32> to vector<8x32xbf16>
    %c0_47 = arith.constant 0 : index
    %c0_48 = arith.constant 0 : index
    %114 = vector.load %arg11[%c0_47, %c0_48] : memref<32x32xbf16, #tpu.memory_space<vmem>>, vector<32x32xbf16>
    %cst_49 = arith.constant dense<0.000000e+00> : vector<8x32xf32>
    %115 = tpu.matmul %113, %114, %cst_49 {dimension_numbers = #tpu.dot_dimension_numbers<[1], [0], [0], [1], [0, 0, 1, 1], [], []>} : vector<8x32xbf16>, vector<32x32xbf16>, vector<8x32xf32> -> vector<8x32xf32>
    %c0_50 = arith.constant 0 : index
    %c0_51 = arith.constant 0 : index
    %116 = vector.load %arg12[%c0_50, %c0_51] : memref<1x32xf32, #tpu.memory_space<vmem>>, vector<1x32xf32>
    %117 = vector.broadcast %116 : vector<1x32xf32> to vector<8x32xf32>
    %118 = arith.addf %115, %117 : vector<8x32xf32>
    %c0_52 = arith.constant 0 : index
    %c0_53 = arith.constant 0 : index
    %c0_54 = arith.constant 0 : index
    %119 = vector.load %arg4[%c0_52, %c0_53, %c0_54] : memref<1x16x32xbf16, #tpu.memory_space<vmem>>, vector<1x16x32xbf16>
    %120 = vector.shape_cast %119 : vector<1x16x32xbf16> to vector<16x32xbf16>
    %c0_55 = arith.constant 0 : index
    %c0_56 = arith.constant 0 : index
    %121 = vector.load %arg13[%c0_55, %c0_56] : memref<32x32xbf16, #tpu.memory_space<vmem>>, vector<32x32xbf16>
    %cst_57 = arith.constant dense<0.000000e+00> : vector<8x32xf32>
    %122 = tpu.matmul %7, %121, %cst_57 {dimension_numbers = #tpu.dot_dimension_numbers<[1], [0], [0], [1], [0, 0, 1, 1], [], []>} : vector<8x32xbf16>, vector<32x32xbf16>, vector<8x32xf32> -> vector<8x32xf32>
    %c0_58 = arith.constant 0 : index
    %c0_59 = arith.constant 0 : index
    %123 = vector.load %arg14[%c0_58, %c0_59] : memref<1x32xf32, #tpu.memory_space<vmem>>, vector<1x32xf32>
    %124 = vector.broadcast %123 : vector<1x32xf32> to vector<8x32xf32>
    %125 = arith.addf %122, %124 : vector<8x32xf32>
    %126 = arith.truncf %125 : vector<8x32xf32> to vector<8x32xbf16>
    %c0_60 = arith.constant 0 : index
    %c0_61 = arith.constant 0 : index
    %127 = vector.load %arg15[%c0_60, %c0_61] : memref<32x32xbf16, #tpu.memory_space<vmem>>, vector<32x32xbf16>
    %cst_62 = arith.constant dense<0.000000e+00> : vector<16x32xf32>
    %128 = tpu.matmul %120, %127, %cst_62 {dimension_numbers = #tpu.dot_dimension_numbers<[1], [0], [0], [1], [0, 0, 1, 1], [], []>} : vector<16x32xbf16>, vector<32x32xbf16>, vector<16x32xf32> -> vector<16x32xf32>
    %c0_63 = arith.constant 0 : index
    %c0_64 = arith.constant 0 : index
    %129 = vector.load %arg16[%c0_63, %c0_64] : memref<1x32xf32, #tpu.memory_space<vmem>>, vector<1x32xf32>
    %130 = vector.broadcast %129 : vector<1x32xf32> to vector<16x32xf32>
    %131 = arith.addf %128, %130 : vector<16x32xf32>
    %132 = arith.truncf %131 : vector<16x32xf32> to vector<16x32xbf16>
    %c0_65 = arith.constant 0 : index
    %c0_66 = arith.constant 0 : index
    %133 = vector.load %arg17[%c0_65, %c0_66] : memref<32x32xbf16, #tpu.memory_space<vmem>>, vector<32x32xbf16>
    %cst_67 = arith.constant dense<0.000000e+00> : vector<16x32xf32>
    %134 = tpu.matmul %120, %133, %cst_67 {dimension_numbers = #tpu.dot_dimension_numbers<[1], [0], [0], [1], [0, 0, 1, 1], [], []>} : vector<16x32xbf16>, vector<32x32xbf16>, vector<16x32xf32> -> vector<16x32xf32>
    %c0_68 = arith.constant 0 : index
    %c0_69 = arith.constant 0 : index
    %135 = vector.load %arg18[%c0_68, %c0_69] : memref<1x32xf32, #tpu.memory_space<vmem>>, vector<1x32xf32>
    %136 = vector.broadcast %135 : vector<1x32xf32> to vector<16x32xf32>
    %137 = arith.addf %134, %136 : vector<16x32xf32>
    %138 = arith.truncf %137 : vector<16x32xf32> to vector<16x32xbf16>
    %139 = vector.extract_strided_slice %126 {offsets = [0, 0], sizes = [8, 8], strides = [1, 1]} : vector<8x32xbf16> to vector<8x8xbf16>
    %140 = vector.extract_strided_slice %132 {offsets = [0, 0], sizes = [16, 8], strides = [1, 1]} : vector<16x32xbf16> to vector<16x8xbf16>
    %cst_70 = arith.constant dense<0.000000e+00> : vector<8x16xf32>
    %141 = tpu.matmul %139, %140, %cst_70 {dimension_numbers = #tpu.dot_dimension_numbers<[1], [1], [0], [0], [0, 0, 1, 0], [], []>} : vector<8x8xbf16>, vector<16x8xbf16>, vector<8x16xf32> -> vector<8x16xf32>
    %142 = vector.broadcast %5 : vector<1x16xf32> to vector<8x16xf32>
    %143 = arith.addf %141, %142 : vector<8x16xf32>
    %cst_71 = arith.constant dense<0xFF800000> : vector<8xf32>
    %144 = vector.multi_reduction <maximumf>, %143, %cst_71 [1] : vector<8x16xf32> to vector<8xf32>
    %145 = vector.shape_cast %144 : vector<8xf32> to vector<8x1xf32>
    %146 = vector.broadcast %145 : vector<8x1xf32> to vector<8x16xf32>
    %147 = arith.subf %143, %146 : vector<8x16xf32>
    %148 = math.exp %147 : vector<8x16xf32>
    %cst_72 = arith.constant dense<0.000000e+00> : vector<8xf32>
    %149 = vector.multi_reduction <add>, %148, %cst_72 [1] : vector<8x16xf32> to vector<8xf32>
    %150 = vector.shape_cast %149 : vector<8xf32> to vector<8x1xf32>
    %151 = tpu.reciprocal %150 {approx = true} : vector<8x1xf32> -> vector<8x1xf32>
    %152 = vector.broadcast %151 : vector<8x1xf32> to vector<8x16xf32>
    %153 = arith.mulf %148, %152 : vector<8x16xf32>
    %154 = vector.broadcast %1 : vector<1x16xf32> to vector<8x16xf32>
    %155 = arith.mulf %153, %154 : vector<8x16xf32>
    %156 = arith.truncf %155 : vector<8x16xf32> to vector<8x16xbf16>
    %157 = vector.extract_strided_slice %138 {offsets = [0, 0], sizes = [16, 8], strides = [1, 1]} : vector<16x32xbf16> to vector<16x8xbf16>
    %cst_73 = arith.constant dense<0.000000e+00> : vector<8x8xf32>
    %158 = tpu.matmul %156, %157, %cst_73 {dimension_numbers = #tpu.dot_dimension_numbers<[1], [0], [0], [1], [0, 0, 1, 1], [], []>} : vector<8x16xbf16>, vector<16x8xbf16>, vector<8x8xf32> -> vector<8x8xf32>
    %c0_74 = arith.constant 0 : index
    %c0_75 = arith.constant 0 : index
    %159 = vector.load %arg26[%c0_74, %c0_75] : memref<8x32xf32, #tpu.memory_space<vmem>>, vector<8x8xf32>
    tpu.vector_store %arg26[%c0_74, %c0_75], %158 {strides = array<i32>} : memref<8x32xf32, #tpu.memory_space<vmem>>, vector<8x8xf32>,
    %160 = vector.extract_strided_slice %126 {offsets = [0, 8], sizes = [8, 8], strides = [1, 1]} : vector<8x32xbf16> to vector<8x8xbf16>
    %161 = vector.extract_strided_slice %132 {offsets = [0, 8], sizes = [16, 8], strides = [1, 1]} : vector<16x32xbf16> to vector<16x8xbf16>
    %cst_76 = arith.constant dense<0.000000e+00> : vector<8x16xf32>
    %162 = tpu.matmul %160, %161, %cst_76 {dimension_numbers = #tpu.dot_dimension_numbers<[1], [1], [0], [0], [0, 0, 1, 0], [], []>} : vector<8x8xbf16>, vector<16x8xbf16>, vector<8x16xf32> -> vector<8x16xf32>
    %163 = vector.broadcast %5 : vector<1x16xf32> to vector<8x16xf32>
    %164 = arith.addf %162, %163 : vector<8x16xf32>
    %cst_77 = arith.constant dense<0xFF800000> : vector<8xf32>
    %165 = vector.multi_reduction <maximumf>, %164, %cst_77 [1] : vector<8x16xf32> to vector<8xf32>
    %166 = vector.shape_cast %165 : vector<8xf32> to vector<8x1xf32>
    %167 = vector.broadcast %166 : vector<8x1xf32> to vector<8x16xf32>
    %168 = arith.subf %164, %167 : vector<8x16xf32>
    %169 = math.exp %168 : vector<8x16xf32>
    %cst_78 = arith.constant dense<0.000000e+00> : vector<8xf32>
    %170 = vector.multi_reduction <add>, %169, %cst_78 [1] : vector<8x16xf32> to vector<8xf32>
    %171 = vector.shape_cast %170 : vector<8xf32> to vector<8x1xf32>
    %172 = tpu.reciprocal %171 {approx = true} : vector<8x1xf32> -> vector<8x1xf32>
    %173 = vector.broadcast %172 : vector<8x1xf32> to vector<8x16xf32>
    %174 = arith.mulf %169, %173 : vector<8x16xf32>
    %175 = vector.broadcast %1 : vector<1x16xf32> to vector<8x16xf32>
    %176 = arith.mulf %174, %175 : vector<8x16xf32>
    %177 = arith.truncf %176 : vector<8x16xf32> to vector<8x16xbf16>
    %178 = vector.extract_strided_slice %138 {offsets = [0, 8], sizes = [16, 8], strides = [1, 1]} : vector<16x32xbf16> to vector<16x8xbf16>
    %cst_79 = arith.constant dense<0.000000e+00> : vector<8x8xf32>
    %179 = tpu.matmul %177, %178, %cst_79 {dimension_numbers = #tpu.dot_dimension_numbers<[1], [0], [0], [1], [0, 0, 1, 1], [], []>} : vector<8x16xbf16>, vector<16x8xbf16>, vector<8x8xf32> -> vector<8x8xf32>
    %c0_80 = arith.constant 0 : index
    %c8_81 = arith.constant 8 : index
    %180 = vector.load %arg26[%c0_80, %c8_81] : memref<8x32xf32, #tpu.memory_space<vmem>>, vector<8x8xf32>
    tpu.vector_store %arg26[%c0_80, %c8_81], %179 {strides = array<i32>} : memref<8x32xf32, #tpu.memory_space<vmem>>, vector<8x8xf32>,
    %181 = vector.extract_strided_slice %126 {offsets = [0, 16], sizes = [8, 8], strides = [1, 1]} : vector<8x32xbf16> to vector<8x8xbf16>
    %182 = vector.extract_strided_slice %132 {offsets = [0, 16], sizes = [16, 8], strides = [1, 1]} : vector<16x32xbf16> to vector<16x8xbf16>
    %cst_82 = arith.constant dense<0.000000e+00> : vector<8x16xf32>
    %183 = tpu.matmul %181, %182, %cst_82 {dimension_numbers = #tpu.dot_dimension_numbers<[1], [1], [0], [0], [0, 0, 1, 0], [], []>} : vector<8x8xbf16>, vector<16x8xbf16>, vector<8x16xf32> -> vector<8x16xf32>
    %184 = vector.broadcast %5 : vector<1x16xf32> to vector<8x16xf32>
    %185 = arith.addf %183, %184 : vector<8x16xf32>
    %cst_83 = arith.constant dense<0xFF800000> : vector<8xf32>
    %186 = vector.multi_reduction <maximumf>, %185, %cst_83 [1] : vector<8x16xf32> to vector<8xf32>
    %187 = vector.shape_cast %186 : vector<8xf32> to vector<8x1xf32>
    %188 = vector.broadcast %187 : vector<8x1xf32> to vector<8x16xf32>
    %189 = arith.subf %185, %188 : vector<8x16xf32>
    %190 = math.exp %189 : vector<8x16xf32>
    %cst_84 = arith.constant dense<0.000000e+00> : vector<8xf32>
    %191 = vector.multi_reduction <add>, %190, %cst_84 [1] : vector<8x16xf32> to vector<8xf32>
    %192 = vector.shape_cast %191 : vector<8xf32> to vector<8x1xf32>
    %193 = tpu.reciprocal %192 {approx = true} : vector<8x1xf32> -> vector<8x1xf32>
    %194 = vector.broadcast %193 : vector<8x1xf32> to vector<8x16xf32>
    %195 = arith.mulf %190, %194 : vector<8x16xf32>
    %196 = vector.broadcast %1 : vector<1x16xf32> to vector<8x16xf32>
    %197 = arith.mulf %195, %196 : vector<8x16xf32>
    %198 = arith.truncf %197 : vector<8x16xf32> to vector<8x16xbf16>
    %199 = vector.extract_strided_slice %138 {offsets = [0, 16], sizes = [16, 8], strides = [1, 1]} : vector<16x32xbf16> to vector<16x8xbf16>
    %cst_85 = arith.constant dense<0.000000e+00> : vector<8x8xf32>
    %200 = tpu.matmul %198, %199, %cst_85 {dimension_numbers = #tpu.dot_dimension_numbers<[1], [0], [0], [1], [0, 0, 1, 1], [], []>} : vector<8x16xbf16>, vector<16x8xbf16>, vector<8x8xf32> -> vector<8x8xf32>
    %c0_86 = arith.constant 0 : index
    %c16_87 = arith.constant 16 : index
    %201 = vector.load %arg26[%c0_86, %c16_87] : memref<8x32xf32, #tpu.memory_space<vmem>>, vector<8x8xf32>
    tpu.vector_store %arg26[%c0_86, %c16_87], %200 {strides = array<i32>} : memref<8x32xf32, #tpu.memory_space<vmem>>, vector<8x8xf32>,
    %202 = vector.extract_strided_slice %126 {offsets = [0, 24], sizes = [8, 8], strides = [1, 1]} : vector<8x32xbf16> to vector<8x8xbf16>
    %203 = vector.extract_strided_slice %132 {offsets = [0, 24], sizes = [16, 8], strides = [1, 1]} : vector<16x32xbf16> to vector<16x8xbf16>
    %cst_88 = arith.constant dense<0.000000e+00> : vector<8x16xf32>
    %204 = tpu.matmul %202, %203, %cst_88 {dimension_numbers = #tpu.dot_dimension_numbers<[1], [1], [0], [0], [0, 0, 1, 0], [], []>} : vector<8x8xbf16>, vector<16x8xbf16>, vector<8x16xf32> -> vector<8x16xf32>
    %205 = vector.broadcast %5 : vector<1x16xf32> to vector<8x16xf32>
    %206 = arith.addf %204, %205 : vector<8x16xf32>
    %cst_89 = arith.constant dense<0xFF800000> : vector<8xf32>
    %207 = vector.multi_reduction <maximumf>, %206, %cst_89 [1] : vector<8x16xf32> to vector<8xf32>
    %208 = vector.shape_cast %207 : vector<8xf32> to vector<8x1xf32>
    %209 = vector.broadcast %208 : vector<8x1xf32> to vector<8x16xf32>
    %210 = arith.subf %206, %209 : vector<8x16xf32>
    %211 = math.exp %210 : vector<8x16xf32>
    %cst_90 = arith.constant dense<0.000000e+00> : vector<8xf32>
    %212 = vector.multi_reduction <add>, %211, %cst_90 [1] : vector<8x16xf32> to vector<8xf32>
    %213 = vector.shape_cast %212 : vector<8xf32> to vector<8x1xf32>
    %214 = tpu.reciprocal %213 {approx = true} : vector<8x1xf32> -> vector<8x1xf32>
    %215 = vector.broadcast %214 : vector<8x1xf32> to vector<8x16xf32>
    %216 = arith.mulf %211, %215 : vector<8x16xf32>
    %217 = vector.broadcast %1 : vector<1x16xf32> to vector<8x16xf32>
    %218 = arith.mulf %216, %217 : vector<8x16xf32>
    %219 = arith.truncf %218 : vector<8x16xf32> to vector<8x16xbf16>
    %220 = vector.extract_strided_slice %138 {offsets = [0, 24], sizes = [16, 8], strides = [1, 1]} : vector<16x32xbf16> to vector<16x8xbf16>
    %cst_91 = arith.constant dense<0.000000e+00> : vector<8x8xf32>
    %221 = tpu.matmul %219, %220, %cst_91 {dimension_numbers = #tpu.dot_dimension_numbers<[1], [0], [0], [1], [0, 0, 1, 1], [], []>} : vector<8x16xbf16>, vector<16x8xbf16>, vector<8x8xf32> -> vector<8x8xf32>
    %c0_92 = arith.constant 0 : index
    %c24_93 = arith.constant 24 : index
    %222 = vector.load %arg26[%c0_92, %c24_93] : memref<8x32xf32, #tpu.memory_space<vmem>>, vector<8x8xf32>
    tpu.vector_store %arg26[%c0_92, %c24_93], %221 {strides = array<i32>} : memref<8x32xf32, #tpu.memory_space<vmem>>, vector<8x8xf32>,
    %c0_94 = arith.constant 0 : index
    %c0_95 = arith.constant 0 : index
    %223 = vector.load %arg26[%c0_94, %c0_95] : memref<8x32xf32, #tpu.memory_space<vmem>>, vector<8x32xf32>
    %224 = arith.truncf %223 : vector<8x32xf32> to vector<8x32xbf16>
    %c0_96 = arith.constant 0 : index
    %c0_97 = arith.constant 0 : index
    %225 = vector.load %arg19[%c0_96, %c0_97] : memref<32x32xbf16, #tpu.memory_space<vmem>>, vector<32x32xbf16>
    %cst_98 = arith.constant dense<0.000000e+00> : vector<8x32xf32>
    %226 = tpu.matmul %224, %225, %cst_98 {dimension_numbers = #tpu.dot_dimension_numbers<[1], [0], [0], [1], [0, 0, 1, 1], [], []>} : vector<8x32xbf16>, vector<32x32xbf16>, vector<8x32xf32> -> vector<8x32xf32>
    %c0_99 = arith.constant 0 : index
    %c0_100 = arith.constant 0 : index
    %227 = vector.load %arg20[%c0_99, %c0_100] : memref<1x32xf32, #tpu.memory_space<vmem>>, vector<1x32xf32>
    %228 = vector.broadcast %227 : vector<1x32xf32> to vector<8x32xf32>
    %229 = arith.addf %226, %228 : vector<8x32xf32>
    %230 = arith.extf %7 : vector<8x32xbf16> to vector<8x32xf32>
    %c0_101 = arith.constant 0 : index
    %c0_102 = arith.constant 0 : index
    %231 = vector.load %arg21[%c0_101, %c0_102] : memref<1x32xf32, #tpu.memory_space<vmem>>, vector<1x32xf32>
    %232 = vector.broadcast %231 : vector<1x32xf32> to vector<8x32xf32>
    %233 = arith.mulf %118, %232 : vector<8x32xf32>
    %c0_103 = arith.constant 0 : index
    %c0_104 = arith.constant 0 : index
    %234 = vector.load %arg22[%c0_103, %c0_104] : memref<1x32xf32, #tpu.memory_space<vmem>>, vector<1x32xf32>
    %235 = vector.broadcast %234 : vector<1x32xf32> to vector<8x32xf32>
    %236 = arith.mulf %229, %235 : vector<8x32xf32>
    %237 = arith.addf %233, %236 : vector<8x32xf32>
    %c0_105 = arith.constant 0 : index
    %c0_106 = arith.constant 0 : index
    %238 = vector.load %arg23[%c0_105, %c0_106] : memref<1x32xf32, #tpu.memory_space<vmem>>, vector<1x32xf32>
    %239 = vector.broadcast %238 : vector<1x32xf32> to vector<8x32xf32>
    %240 = arith.mulf %230, %239 : vector<8x32xf32>
    %241 = arith.addf %237, %240 : vector<8x32xf32>
    %cst_107 = arith.constant dense<0.000000e+00> : vector<8xf32>
    %242 = vector.multi_reduction <add>, %241, %cst_107 [1] : vector<8x32xf32> to vector<8xf32>
    %243 = vector.shape_cast %242 : vector<8xf32> to vector<8x1xf32>
    %c0_108 = arith.constant 0 : index
    %c0_109 = arith.constant 0 : index
    %244 = vector.load %arg24[%c0_108, %c0_109] : memref<1x1xf32, #tpu.memory_space<vmem>>, vector<1x1xf32>
    %245 = vector.broadcast %244 : vector<1x1xf32> to vector<8x1xf32>
    %246 = arith.addf %243, %245 : vector<8x1xf32>
    %247 = arith.negf %246 : vector<8x1xf32>
    %248 = math.exp %247 : vector<8x1xf32>
    %cst_110 = arith.constant 1.000000e+00 : f32
    %249 = vector.broadcast %cst_110 : f32 to vector<8x1xf32>
    %250 = arith.addf %249, %248 : vector<8x1xf32>
    %251 = arith.divf %249, %250 : vector<8x1xf32>
    %252 = vector.broadcast %251 : vector<8x1xf32> to vector<8x32xf32>
    %253 = arith.mulf %252, %118 : vector<8x32xf32>
    %cst_111 = arith.constant 1.000000e+00 : f32
    %254 = vector.broadcast %cst_111 : f32 to vector<8x1xf32>
    %255 = arith.subf %254, %251 : vector<8x1xf32>
    %256 = vector.broadcast %255 : vector<8x1xf32> to vector<8x32xf32>
    %257 = arith.mulf %256, %229 : vector<8x32xf32>
    %258 = arith.addf %253, %257 : vector<8x32xf32>
    %c0_112 = arith.constant 0 : index
    %c0_113 = arith.constant 0 : index
    %c0_114 = arith.constant 0 : index
    %259 = vector.load %arg25[%c0_112, %c0_113, %c0_114] : memref<1x8x32xf32, #tpu.memory_space<vmem>>, vector<1x8x32xf32>
    %260 = vector.shape_cast %259 : vector<1x8x32xf32> to vector<8x32xf32>
    %261 = vector.shape_cast %258 : vector<8x32xf32> to vector<1x8x32xf32>
    tpu.vector_store %arg25[%c0_112, %c0_113, %c0_114], %261 {strides = array<i32>} : memref<1x8x32xf32, #tpu.memory_space<vmem>>, vector<1x8x32xf32>,
    return
  }
  func.func @transform_0(%arg0: i32) -> (i32, i32, i32) {
    %c0_i32 = arith.constant 0 : i32
    %c0_i32_0 = arith.constant 0 : i32
    %c0_i32_1 = arith.constant 0 : i32
    return %arg0, %c0_i32, %c0_i32_0 : i32, i32, i32
  }
  func.func @transform_1(%arg0: i32) -> (i32, i32, i32) {
    %c0_i32 = arith.constant 0 : i32
    %c0_i32_0 = arith.constant 0 : i32
    %c0_i32_1 = arith.constant 0 : i32
    return %arg0, %c0_i32, %c0_i32_0 : i32, i32, i32
  }
  func.func @transform_2(%arg0: i32) -> (i32, i32, i32) {
    %c0_i32 = arith.constant 0 : i32
    %c0_i32_0 = arith.constant 0 : i32
    %c0_i32_1 = arith.constant 0 : i32
    return %arg0, %c0_i32, %c0_i32_0 : i32, i32, i32
  }
  func.func @transform_3(%arg0: i32) -> (i32, i32, i32) {
    %c0_i32 = arith.constant 0 : i32
    %c0_i32_0 = arith.constant 0 : i32
    %c0_i32_1 = arith.constant 0 : i32
    return %arg0, %c0_i32, %c0_i32_0 : i32, i32, i32
  }
  func.func @transform_4(%arg0: i32) -> (i32, i32) {
    %c0_i32 = arith.constant 0 : i32
    %c0_i32_0 = arith.constant 0 : i32
    %c0_i32_1 = arith.constant 0 : i32
    return %c0_i32, %c0_i32_0 : i32, i32
  }
  func.func @transform_5(%arg0: i32) -> (i32, i32) {
    %c0_i32 = arith.constant 0 : i32
    %c0_i32_0 = arith.constant 0 : i32
    %c0_i32_1 = arith.constant 0 : i32
    return %c0_i32, %c0_i32_0 : i32, i32
  }
  func.func @transform_6(%arg0: i32) -> (i32, i32) {
    %c0_i32 = arith.constant 0 : i32
    %c0_i32_0 = arith.constant 0 : i32
    %c0_i32_1 = arith.constant 0 : i32
    return %c0_i32, %c0_i32_0 : i32, i32
  }
  func.func @transform_7(%arg0: i32) -> (i32, i32) {
    %c0_i32 = arith.constant 0 : i32
    %c0_i32_0 = arith.constant 0 : i32
    %c0_i32_1 = arith.constant 0 : i32
    return %c0_i32, %c0_i32_0 : i32, i32
  }
  func.func @transform_8(%arg0: i32) -> (i32, i32) {
    %c0_i32 = arith.constant 0 : i32
    %c0_i32_0 = arith.constant 0 : i32
    %c0_i32_1 = arith.constant 0 : i32
    return %c0_i32, %c0_i32_0 : i32, i32
  }
  func.func @transform_9(%arg0: i32) -> (i32, i32) {
    %c0_i32 = arith.constant 0 : i32
    %c0_i32_0 = arith.constant 0 : i32
    %c0_i32_1 = arith.constant 0 : i32
    return %c0_i32, %c0_i32_0 : i32, i32
  }
  func.func @transform_10(%arg0: i32) -> (i32, i32) {
    %c0_i32 = arith.constant 0 : i32
    %c0_i32_0 = arith.constant 0 : i32
    %c0_i32_1 = arith.constant 0 : i32
    return %c0_i32, %c0_i32_0 : i32, i32
  }
  func.func @transform_11(%arg0: i32) -> (i32, i32) {
    %c0_i32 = arith.constant 0 : i32
    %c0_i32_0 = arith.constant 0 : i32
    %c0_i32_1 = arith.constant 0 : i32
    return %c0_i32, %c0_i32_0 : i32, i32
  }
  func.func @transform_12(%arg0: i32) -> (i32, i32) {
    %c0_i32 = arith.constant 0 : i32
    %c0_i32_0 = arith.constant 0 : i32
    %c0_i32_1 = arith.constant 0 : i32
    return %c0_i32, %c0_i32_0 : i32, i32
  }
  func.func @transform_13(%arg0: i32) -> (i32, i32) {
    %c0_i32 = arith.constant 0 : i32
    %c0_i32_0 = arith.constant 0 : i32
    %c0_i32_1 = arith.constant 0 : i32
    return %c0_i32, %c0_i32_0 : i32, i32
  }
  func.func @transform_14(%arg0: i32) -> (i32, i32) {
    %c0_i32 = arith.constant 0 : i32
    %c0_i32_0 = arith.constant 0 : i32
    %c0_i32_1 = arith.constant 0 : i32
    return %c0_i32, %c0_i32_0 : i32, i32
  }
  func.func @transform_15(%arg0: i32) -> (i32, i32) {
    %c0_i32 = arith.constant 0 : i32
    %c0_i32_0 = arith.constant 0 : i32
    %c0_i32_1 = arith.constant 0 : i32
    return %c0_i32, %c0_i32_0 : i32, i32
  }
  func.func @transform_16(%arg0: i32) -> (i32, i32) {
    %c0_i32 = arith.constant 0 : i32
    %c0_i32_0 = arith.constant 0 : i32
    %c0_i32_1 = arith.constant 0 : i32
    return %c0_i32, %c0_i32_0 : i32, i32
  }
  func.func @transform_17(%arg0: i32) -> (i32, i32) {
    %c0_i32 = arith.constant 0 : i32
    %c0_i32_0 = arith.constant 0 : i32
    %c0_i32_1 = arith.constant 0 : i32
    return %c0_i32, %c0_i32_0 : i32, i32
  }
  func.func @transform_18(%arg0: i32) -> (i32, i32) {
    %c0_i32 = arith.constant 0 : i32
    %c0_i32_0 = arith.constant 0 : i32
    %c0_i32_1 = arith.constant 0 : i32
    return %c0_i32, %c0_i32_0 : i32, i32
  }
  func.func @transform_19(%arg0: i32) -> (i32, i32) {
    %c0_i32 = arith.constant 0 : i32
    %c0_i32_0 = arith.constant 0 : i32
    %c0_i32_1 = arith.constant 0 : i32
    return %c0_i32, %c0_i32_0 : i32, i32
  }
  func.func @transform_20(%arg0: i32) -> (i32, i32) {
    %c0_i32 = arith.constant 0 : i32
    %c0_i32_0 = arith.constant 0 : i32
    %c0_i32_1 = arith.constant 0 : i32
    return %c0_i32, %c0_i32_0 : i32, i32
  }
  func.func @transform_21(%arg0: i32) -> (i32, i32) {
    %c0_i32 = arith.constant 0 : i32
    %c0_i32_0 = arith.constant 0 : i32
    %c0_i32_1 = arith.constant 0 : i32
    return %c0_i32, %c0_i32_0 : i32, i32
  }
  func.func @transform_22(%arg0: i32) -> (i32, i32) {
    %c0_i32 = arith.constant 0 : i32
    %c0_i32_0 = arith.constant 0 : i32
    %c0_i32_1 = arith.constant 0 : i32
    return %c0_i32, %c0_i32_0 : i32, i32
  }
  func.func @transform_23(%arg0: i32) -> (i32, i32) {
    %c0_i32 = arith.constant 0 : i32
    %c0_i32_0 = arith.constant 0 : i32
    %c0_i32_1 = arith.constant 0 : i32
    return %c0_i32, %c0_i32_0 : i32, i32
  }
  func.func @transform_24(%arg0: i32) -> (i32, i32, i32) {
    %c0_i32 = arith.constant 0 : i32
    %c0_i32_0 = arith.constant 0 : i32
    %c0_i32_1 = arith.constant 0 : i32
    return %arg0, %c0_i32, %c0_i32_0 : i32, i32, i32
  }
}

</mosaic_0001>

<bundles_post_ra>
// kernel: moe_attn_forward.1
= control target key start
LH: loop header
LB: loop body
LE: loop exit
PB: predicated region body
PF: predicated region fallthrough
CT: control target
= control target key end

     0   :  { %s4197_s0 = inlined_call_operand.vmem [shape: f32[2,1,16], index: 0, kind: input, shape index: {}]   ;;  %s4198_s1 = inlined_call_operand.vmem [shape: bf16[2,8,32], index: 1, kind: input, shape index: {}]   ;;  %s4199_s2 = inlined_call_operand.vmem [shape: bf16[2,16,32], index: 2, kind: input, shape index: {}]   ;;  %s4200_s3 = inlined_call_operand.vmem [shape: bf16[2,16,32], index: 3, kind: input, shape index: {}]   ;;  %s4201_s4 = inlined_call_operand.vmem [shape: bf16[32,32], index: 4, kind: input, shape index: {}]   ;;  %s4202_s5 = inlined_call_operand.hbm [shape: f32[1,32], index: 5, kind: input, shape index: {}]   ;;  %s4203_s6 = inlined_call_operand.vmem [shape: bf16[32,32], index: 6, kind: input, shape index: {}]   ;;  %s4204_s7 = inlined_call_operand.hbm [shape: f32[1,32], index: 7, kind: input, shape index: {}]   ;;  %s4205_s8 = inlined_call_operand.vmem [shape: bf16[32,32], index: 8, kind: input, shape index: {}]   ;;  %s4206_s9 = inlined_call_operand.hbm [shape: f32[1,32], index: 9, kind: input, shape index: {}]   ;;  %s4207_s10 = inlined_call_operand.vmem [shape: bf16[32,32], index: 10, kind: input, shape index: {}]   ;;  %s4208_s11 = inlined_call_operand.hbm [shape: f32[1,32], index: 11, kind: input, shape index: {}]   ;;  %s4209_s12 = inlined_call_operand.vmem [shape: bf16[32,32], index: 12, kind: input, shape index: {}]   ;;  %s4210_s13 = inlined_call_operand.hbm [shape: f32[1,32], index: 13, kind: input, shape index: {}]   ;;  %s4211_s14 = inlined_call_operand.vmem [shape: bf16[32,32], index: 14, kind: input, shape index: {}]   ;;  %s4212_s15 = inlined_call_operand.hbm [shape: f32[1,32], index: 15, kind: input, shape index: {}]   ;;  %s4213_s16 = inlined_call_operand.vmem [shape: bf16[32,32], index: 16, kind: input, shape index: {}]   ;;  %s4214_s17 = inlined_call_operand.hbm [shape: f32[1,32], index: 17, kind: input, shape index: {}]   ;;  %s4215_s18 = inlined_call_operand.vmem [shape: bf16[32,32], index: 18, kind: input, shape index: {}]   ;;  %s4216_s19 = inlined_call_operand.hbm [shape: f32[1,32], index: 19, kind: input, shape index: {}]   ;;  %s4217_s20 = inlined_call_operand.hbm [shape: f32[1,32], index: 20, kind: input, shape index: {}]   ;;  %s4218_s21 = inlined_call_operand.vmem [shape: f32[1,32], index: 21, kind: input, shape index: {}]   ;;  %s4219_s22 = inlined_call_operand.vmem [shape: f32[1,32], index: 22, kind: input, shape index: {}]   ;;  %s4220_s23 = inlined_call_operand.<no memory space> [shape: f32[1,1], index: 23, kind: input, shape index: {}]   ;;  %s4221_s24 = inlined_call_operand.hbm [shape: f32[2,8,32], index: 24, kind: output, shape index: {}]  }
   0x1   :  { %4242 = sst [smem:[#allocation34_spill]] %s4197_s0  ;;  %v29_v0 = vstv %s4220_s23 }
   0x2   :  { %4243 = sst [smem:[#allocation35_spill]] %s4198_s1  ;;  %30 = vst [vmem:[#allocation3] sm:$0x1] %v29_v0 }
   0x3   :  { %4244 = sst [smem:[#allocation36_spill]] %s4199_s2 }
   0x4   :  { %4245 = sst [smem:[#allocation37_spill]] %s4200_s3 }
   0x5   :  { %4246 = sst [smem:[#allocation38_spill]] %s4201_s4 }
   0x6   :  { %4247 = sst [smem:[#allocation39_spill]] %s4202_s5 }
   0x7   :  { %4248 = sst [smem:[#allocation40_spill]] %s4203_s6 }
   0x8   :  { %4249 = sst [smem:[#allocation41_spill]] %s4204_s7 }
   0x9   :  { %4250 = sst [smem:[#allocation42_spill]] %s4205_s8 }
   0xa   :  { %4251 = sst [smem:[#allocation43_spill]] %s4206_s9 }
   0xb   :  { %4252 = sst [smem:[#allocation44_spill]] %s4208_s11 }
   0xc   :  { %4253 = sst [smem:[#allocation45_spill]] %s4210_s13 }
   0xd   :  { %4254 = sst [smem:[#allocation46_spill]] %s4221_s24 }
   0xe   :  { %31 = vsyncpa [#allocation5], 0 }
   0xf   :  { %32 = vsyncpa [#allocation8], 0 }
  0x10   :  { %33 = vsyncpa [#allocation11], 0 }
  0x11   :  { %34 = vsyncpa [#allocation14], 0 }
  0x12   :  { %35 = vsyncpa [#allocation17], 0 }
  0x13   :  { %36 = vsyncpa [#allocation6], 0 }
  0x14   :  { %38 = vsyncpa [#allocation6 + $0x1], 0  ;;  %s3605_s27 = smov 0   ;;  %s3607_s28 = smov 0  }
  0x15   :  { %s3609_s6 = smov 0   ;;  %s3611_s2 = smov 0  }
  0x16 LB: > { %4255 = sst [smem:[#allocation26_spill]] %s3444_s27  ;;  %s3626_s23 = sadd.s32 4294967295, %s3456_s2   ;;  %s3456_s2 = sphi %s3611_s2, %s4302_s2   ;;  %s3452_s6 = sphi %s3609_s6, %s4305_s6   ;;  %s3448_s28 = sphi %s3607_s28, %s4304_s28   ;;  %s3444_s27 = sphi %s3605_s27, %s4303_s27  }
  0x17   : > { %4256 = sst [smem:[#allocation27_spill]] %s3448_s28  ;;  %s2621_s29 = sadd.s32 4294967294, %s3456_s2  }
  0x18   : > { %4257 = sst [smem:[#allocation28_spill]] %s3452_s6  ;;  %s3630_s0 = sadd.s32 1, %s3456_s2  }
  0x19   : > { %4258 = sst [smem:[#allocation29_spill]] %s3456_s2  ;;  %s575_s7 = sadd.s32 1, %s3452_s6 }
  0x1a   : > { %4259 = sst [smem:[#allocation30_spill]] %s3630_s0  ;;  %s572_s30 = ssub.s32 %s3456_s2, %s3630_s0 }
  0x1b   : > { %p585_p0 = scmp.ne.s32.totalorder %s3452_s6, %s3448_s28  ;;  %p573_p1 = scmp.eq.s32.totalorder %s572_s30, 0 }
  0x1c   : > { %p586_p2 = scmp.eq.s32.totalorder %s3626_s23, 1  ;;  %p591_p3 = scmp.ne.s32.totalorder %s3448_s28, %s3444_s27 }
  0x1d   : > { %p592_p4 = scmp.eq.s32.totalorder %s2621_s29, 1  ;;  %p2622_p7 = scmp.ge.s32.totalorder %s3456_s2, 1 }
  0x1e   : > { %s3641_s3 = scalar_select %p573_p1, %s3452_s6, %s575_s7  }
  0x1f   : > { %p3643_p5 = por %p586_p2, %p585_p0  ;;  %p3647_p6 = por %p592_p4, %p591_p3 }
  0x20   : > { %4260 = sst [smem:[#allocation31_spill]] %s3641_s3  ;;  %p599_p8 = scmp.lt.s32.totalorder %s3456_s2, 3 }
  0x21   : > { %s4261_s25 = scalar_select %p3643_p5, 1, 0 }
  0x22   : > { %s4263_s8 = scalar_select %p3647_p6, 1, 0 }
  0x23   : > { %4262 = sst [smem:[#allocation32_spill]] %s4261_s25  ;;  %p4234_p9 = scmp.eq.s32.totalorder %s3626_s23, 0 }
  0x24   : > { %4264 = sst [smem:[#allocation33_spill]] %s4263_s8  ;;  %p3654_p10 = pnand %p2622_p7, %p599_p8 }
  0x25   : > { %s3458_s1 = smov [#allocation7]   ;;  %s3459_s26 = smov [#allocation10]  }
  0x26   : > { %s4265_s4 = scalar_select %p3654_p10, 1, 0 }
  0x27   : > { %s629_s5 = sshll.u32 %s3458_s1, 4  ;;  %p2965_p11 = pneg %p3654_p10  ;;  %s630_s5 = int_to_ptr.vmem [resolvable:$true] %s629_s5 }
  0x28   : > { %s657_s29 = sshll.u32 %s3459_s26, 4  ;;  %s3460_s30 = smov [#allocation13]   ;;  %s3666_s29 = int_to_ptr.vmem [resolvable:$true] %s657_s29 }
  0x29   : > { %p3662_p12 = pnand %p4234_p9, %p2965_p11  ;;  %s685_s3 = sshll.u32 %s3460_s30, 4  ;;  %s3668_s3 = int_to_ptr.vmem [resolvable:$true] %s685_s3 }
  0x2a   : > { %s4267_s1 = sld [smem:[#allocation41_spill]] }
  0x2b   : > { %p3678_p0 = pneg %p3662_p12 }
  0x30   : > { %s3122_s8 = scalar_lea.hbm %s4267_s1, 16 }
  0x31   : > { %p3123_p13 = scmp.ne.s32.totalorder %s4267_s1, %s3122_s8  ;;  %p3129_p3 = scmp.lt.u32.totalorder %s3122_s8, %s4267_s1 }
  0x33   : > { %p3125_p1 = pnand %p3678_p0, %p3123_p13 }
  0x35   : > { %p3126_p2 = pneg %p3125_p1 }
  0x37   : > { %p3131_p4 = pnand %p3129_p3, %p3126_p2 }
  0x39   : > { %3134 = shalt.err (!%p3131_p4)
}
  0x3a   : > { %s3135_s6 = scalar_lea.vmem %s630_s5, 16  ;;  %s3142_s27 = scalar_lea.vmem %s630_s5, 32 }
  0x3b   : > { %p3136_p7 = scmp.ne.s32.totalorder %s630_s5, %s3135_s6  ;;  %p3143_p9 = scmp.lt.s32.totalorder %s630_s5, %s630_s5 }
  0x3c   : > { %p3144_p6 = scmp.lt.s32.totalorder %s3142_s27, %s3135_s6 }
  0x3d   : > { %p3138_p8 = pnand %p3136_p7, %p3678_p0 }
  0x3e   : > { %p3145_p5 = por %p3144_p6, %p3143_p9 }
  0x3f   : > { %p3139_p11 = pneg %p3138_p8 }
  0x41   : > { %p3146_p10 = pnand %p3145_p5, %p3139_p11 }
  0x43   : > { %3149 = shalt.err (!%p3146_p10)
}
  0x44   : > { %2971 = dma.hbm_to_vmem [thread:$0]  (!%p3662_p12), %s4267_s1, 16, %s630_s5, [#allocation8]  }
  0x45   : > { %s4269_s11 = sld [smem:[#allocation44_spill]] }
  0x4b   : > { %s3150_s30 = scalar_lea.hbm %s4269_s11, 16 }
  0x4c   : > { %p3151_p13 = scmp.ne.s32.totalorder %s4269_s11, %s3150_s30  ;;  %p3157_p5 = scmp.lt.u32.totalorder %s3150_s30, %s4269_s11 }
  0x4e   : > { %p3153_p1 = pnand %p3151_p13, %p3678_p0 }
  0x50   : > { %p3154_p6 = pneg %p3153_p1 }
  0x52   : > { %p3159_p9 = pnand %p3157_p5, %p3154_p6 }
  0x54   : > { %3162 = shalt.err (!%p3159_p9)
}
  0x55   : > { %s3163_s5 = scalar_lea.vmem %s3666_s29, 16  ;;  %s3170_s28 = scalar_lea.vmem %s3666_s29, 32 }
  0x56   : > { %p3164_p10 = scmp.ne.s32.totalorder %s3666_s29, %s3163_s5  ;;  %p3171_p4 = scmp.lt.s32.totalorder %s3666_s29, %s3666_s29 }
  0x57   : > { %p3172_p7 = scmp.lt.s32.totalorder %s3170_s28, %s3163_s5 }
  0x58   : > { %p3166_p2 = pnand %p3164_p10, %p3678_p0 }
  0x59   : > { %p3173_p8 = por %p3172_p7, %p3171_p4 }
  0x5a   : > { %p3167_p3 = pneg %p3166_p2 }
  0x5c   : > { %p3174_p11 = pnand %p3173_p8, %p3167_p3 }
  0x5e   : > { %3177 = shalt.err (!%p3174_p11)
}
  0x5f   : > { %2977 = dma.hbm_to_vmem [thread:$0]  (!%p3662_p12), %s4269_s11, 16, %s3666_s29, [#allocation11]  }
  0x60   : > { %s3178_s8 = scalar_lea.hbm %s4212_s15, 16 }
  0x61   : > { %p3179_p13 = scmp.ne.s32.totalorder %s4212_s15, %s3178_s8  ;;  %p3185_p5 = scmp.lt.u32.totalorder %s3178_s8, %s4212_s15 }
  0x63   : > { %p3181_p1 = pnand %p3179_p13, %p3678_p0 }
  0x65   : > { %p3182_p6 = pneg %p3181_p1 }
  0x67   : > { %p3187_p9 = pnand %p3185_p5, %p3182_p6 }
  0x69   : > { %3190 = shalt.err (!%p3187_p9)
}
  0x6a   : > { %s3191_s29 = scalar_lea.vmem %s3668_s3, 16  ;;  %s3198_s28 = scalar_lea.vmem %s3668_s3, 32 }
  0x6b   : > { %p3192_p10 = scmp.ne.s32.totalorder %s3668_s3, %s3191_s29  ;;  %p3199_p4 = scmp.lt.s32.totalorder %s3668_s3, %s3668_s3 }
  0x6c   : > { %p3200_p7 = scmp.lt.s32.totalorder %s3198_s28, %s3191_s29 }
  0x6d   : > { %p3194_p2 = pnand %p3192_p10, %p3678_p0 }
  0x6e   : > { %p3201_p8 = por %p3200_p7, %p3199_p4 }
  0x6f   : > { %p3195_p3 = pneg %p3194_p2 }
  0x71   : > { %p3202_p11 = pnand %p3201_p8, %p3195_p3 }
  0x73   : > { %3205 = shalt.err (!%p3202_p11)
}
  0x74   : > { %2983 = dma.hbm_to_vmem [thread:$0]  (!%p3662_p12), %s4212_s15, 16, %s3668_s3, [#allocation14]  }
  0x75   : > { %s3461_s0 = smov [#allocation16]   ;;  %s3462_s8 = smov [#allocation4]  }
  0x76   : > { %s713_s24 = sshll.u32 %s3461_s0, 4  ;;  %s615_s30 = sshll.u32 %s3462_s8, 4  ;;  %s714_s24 = int_to_ptr.vmem [resolvable:$true] %s713_s24  ;;  %s616_s30 = int_to_ptr.vmem [resolvable:$true] %s615_s30 }
  0x77   : > { %s3206_s5 = scalar_lea.hbm %s4216_s19, 16 }
  0x78   : > { %p3207_p13 = scmp.ne.s32.totalorder %s4216_s19, %s3206_s5  ;;  %p3213_p5 = scmp.lt.u32.totalorder %s3206_s5, %s4216_s19 }
  0x7a   : > { %p3209_p1 = pnand %p3207_p13, %p3678_p0 }
  0x7c   : > { %p3210_p6 = pneg %p3209_p1 }
  0x7e   : > { %p3215_p9 = pnand %p3213_p5, %p3210_p6 }
  0x80   : > { %3218 = shalt.err (!%p3215_p9)
}
  0x81   : > { %s3219_s3 = scalar_lea.vmem %s714_s24, 16  ;;  %s3226_s2 = scalar_lea.vmem %s714_s24, 32 }
  0x82   : > { %p3220_p10 = scmp.ne.s32.totalorder %s714_s24, %s3219_s3  ;;  %p3227_p4 = scmp.lt.s32.totalorder %s714_s24, %s714_s24 }
  0x83   : > { %p3228_p7 = scmp.lt.s32.totalorder %s3226_s2, %s3219_s3 }
  0x84   : > { %p3222_p2 = pnand %p3220_p10, %p3678_p0 }
  0x85   : > { %p3229_p8 = por %p3228_p7, %p3227_p4 }
  0x86   : > { %p3223_p3 = pneg %p3222_p2 }
  0x88   : > { %p3230_p11 = pnand %p3229_p8, %p3223_p3 }
  0x8a   : > { %3233 = shalt.err (!%p3230_p11)
}
  0x8b   : > { %2989 = dma.hbm_to_vmem [thread:$0]  (!%p3662_p12), %s4216_s19, 16, %s714_s24, [#allocation17]  }
  0x8c   : > { %s4270_s27 = sld [smem:[#allocation39_spill]] }
  0x92   : > { %s4271_s5 = smov %s4270_s27  ;;  %s3234_s29 = scalar_lea.hbm %s4270_s27, 16 }
  0x93   : > { %p3235_p13 = scmp.ne.s32.totalorder %s4271_s5, %s3234_s29  ;;  %p3241_p5 = scmp.lt.u32.totalorder %s3234_s29, %s4271_s5 }
  0x95   : > { %p3237_p1 = pnand %p3235_p13, %p3678_p0 }
  0x97   : > { %p3238_p6 = pneg %p3237_p1 }
  0x99   : > { %p3243_p9 = pnand %p3241_p5, %p3238_p6 }
  0x9b   : > { %3246 = shalt.err (!%p3243_p9)
}
  0x9c   : > { %s3247_s0 = scalar_lea.vmem %s616_s30, 16  ;;  %s3254_s24 = scalar_lea.vmem %s616_s30, 32 }
  0x9d   : > { %p3248_p10 = scmp.ne.s32.totalorder %s616_s30, %s3247_s0  ;;  %p3255_p4 = scmp.lt.s32.totalorder %s616_s30, %s616_s30 }
  0x9e   : > { %p3256_p7 = scmp.lt.s32.totalorder %s3254_s24, %s3247_s0 }
  0x9f   : > { %p3250_p2 = pnand %p3248_p10, %p3678_p0 }
  0xa0   : > { %p3257_p8 = por %p3256_p7, %p3255_p4 }
  0xa1   : > { %p3251_p3 = pneg %p3250_p2 }
  0xa3   : > { %p3258_p11 = pnand %p3257_p8, %p3251_p3 }
  0xa5   : > { %3261 = shalt.err (!%p3258_p11)
}
  0xa6   : > { %2968 = dma.hbm_to_vmem [thread:$0]  (!%p3662_p12), %s4271_s5, 16, %s616_s30, [#allocation5]  }
  0xa7   : > { %s3463_s6 = smov [#allocation9]   ;;  %s3464_s29 = smov [#allocation12]  }
  0xa8   : > { %s643_s27 = sshll.u32 %s3463_s6, 4  ;;  %s671_s28 = sshll.u32 %s3464_s29, 4  ;;  %s644_s27 = int_to_ptr.vmem [resolvable:$true] %s643_s27  ;;  %s672_s28 = int_to_ptr.vmem [resolvable:$true] %s671_s28 }
  0xa9   : > { %s4272_s9 = sld [smem:[#allocation43_spill]] }
  0xaf   : > { %s3262_s2 = scalar_lea.hbm %s4272_s9, 16 }
  0xb0   : > { %p3263_p13 = scmp.ne.s32.totalorder %s4272_s9, %s3262_s2  ;;  %p3269_p5 = scmp.lt.u32.totalorder %s3262_s2, %s4272_s9 }
  0xb2   : > { %p3265_p1 = pnand %p3263_p13, %p3678_p0 }
  0xb4   : > { %p3266_p6 = pneg %p3265_p1 }
  0xb6   : > { %p3271_p9 = pnand %p3269_p5, %p3266_p6 }
  0xb8   : > { %3274 = shalt.err (!%p3271_p9)
}
  0xb9   : > { %s3275_s30 = scalar_lea.vmem %s644_s27, 16  ;;  %s3282_s1 = scalar_lea.vmem %s644_s27, 32 }
  0xba   : > { %p3276_p10 = scmp.ne.s32.totalorder %s644_s27, %s3275_s30  ;;  %p3283_p4 = scmp.lt.s32.totalorder %s644_s27, %s644_s27 }
  0xbb   : > { %p3284_p7 = scmp.lt.s32.totalorder %s3282_s1, %s3275_s30 }
  0xbc   : > { %p3278_p2 = pnand %p3276_p10, %p3678_p0 }
  0xbd   : > { %p3285_p8 = por %p3284_p7, %p3283_p4 }
  0xbe   : > { %p3279_p3 = pneg %p3278_p2 }
  0xc0   : > { %p3286_p11 = pnand %p3285_p8, %p3279_p3 }
  0xc2   : > { %3289 = shalt.err (!%p3286_p11)
}
  0xc3   : > { %2974 = dma.hbm_to_vmem [thread:$0]  (!%p3662_p12), %s4272_s9, 16, %s644_s27, [#allocation8]  }
  0xc4   : > { %s4273_s13 = sld [smem:[#allocation45_spill]] }
  0xca   : > { %s3290_s3 = scalar_lea.hbm %s4273_s13, 16 }
  0xcb   : > { %p3291_p13 = scmp.ne.s32.totalorder %s4273_s13, %s3290_s3  ;;  %p3297_p5 = scmp.lt.u32.totalorder %s3290_s3, %s4273_s13 }
  0xcd   : > { %p3293_p1 = pnand %p3291_p13, %p3678_p0 }
  0xcf   : > { %p3294_p6 = pneg %p3293_p1 }
  0xd1   : > { %p3299_p9 = pnand %p3297_p5, %p3294_p6 }
  0xd3   : > { %3302 = shalt.err (!%p3299_p9)
}
  0xd4   : > { %s3303_s30 = scalar_lea.vmem %s672_s28, 16  ;;  %s3310_s27 = scalar_lea.vmem %s672_s28, 32 }
  0xd5   : > { %p3304_p10 = scmp.ne.s32.totalorder %s672_s28, %s3303_s30  ;;  %p3311_p4 = scmp.lt.s32.totalorder %s672_s28, %s672_s28 }
  0xd6   : > { %p3312_p7 = scmp.lt.s32.totalorder %s3310_s27, %s3303_s30 }
  0xd7   : > { %p3306_p2 = pnand %p3304_p10, %p3678_p0 }
  0xd8   : > { %p3313_p8 = por %p3312_p7, %p3311_p4 }
  0xd9   : > { %p3307_p3 = pneg %p3306_p2 }
  0xdb   : > { %p3314_p11 = pnand %p3313_p8, %p3307_p3 }
  0xdd   : > { %3317 = shalt.err (!%p3314_p11)
}
  0xde   : > { %2980 = dma.hbm_to_vmem [thread:$0]  (!%p3662_p12), %s4273_s13, 16, %s672_s28, [#allocation11]  }
  0xdf   : > { %s3465_s29 = smov [#allocation15]   ;;  %s3466_s25 = smov [#allocation18]  }
  0xe0   : > { %s699_s11 = sshll.u32 %s3465_s29, 4  ;;  %s724_s3 = sshll.u32 %s3466_s25, 4  ;;  %s700_s11 = int_to_ptr.vmem [resolvable:$true] %s699_s11  ;;  %s725_s3 = int_to_ptr.vmem [resolvable:$true] %s724_s3 }
  0xe1   : > { %s3318_s24 = scalar_lea.hbm %s4214_s17, 16 }
  0xe2   : > { %p3319_p13 = scmp.ne.s32.totalorder %s4214_s17, %s3318_s24  ;;  %p3325_p5 = scmp.lt.u32.totalorder %s3318_s24, %s4214_s17 }
  0xe4   : > { %p3321_p1 = pnand %p3319_p13, %p3678_p0 }
  0xe6   : > { %p3322_p6 = pneg %p3321_p1 }
  0xe8   : > { %p3327_p9 = pnand %p3325_p5, %p3322_p6 }
  0xea   : > { %3330 = shalt.err (!%p3327_p9)
}
  0xeb   : > { %s3331_s28 = scalar_lea.vmem %s700_s11, 16  ;;  %s3338_s6 = scalar_lea.vmem %s700_s11, 32 }
  0xec   : > { %p3332_p10 = scmp.ne.s32.totalorder %s700_s11, %s3331_s28  ;;  %p3339_p4 = scmp.lt.s32.totalorder %s700_s11, %s700_s11 }
  0xed   : > { %p3340_p7 = scmp.lt.s32.totalorder %s3338_s6, %s3331_s28 }
  0xee   : > { %p3334_p2 = pnand %p3332_p10, %p3678_p0 }
  0xef   : > { %p3341_p8 = por %p3340_p7, %p3339_p4 }
  0xf0   : > { %p3335_p3 = pneg %p3334_p2 }
  0xf2   : > { %p3342_p11 = pnand %p3341_p8, %p3335_p3 }
  0xf4   : > { %3345 = shalt.err (!%p3342_p11)
}
  0xf5   : > { %2986 = dma.hbm_to_vmem [thread:$0]  (!%p3662_p12), %s4214_s17, 16, %s700_s11, [#allocation14]  }
  0xf6   : > { %s3346_s24 = scalar_lea.hbm %s4217_s20, 16 }
  0xf7   : > { %p3347_p13 = scmp.ne.s32.totalorder %s4217_s20, %s3346_s24  ;;  %p3353_p5 = scmp.lt.u32.totalorder %s3346_s24, %s4217_s20 }
  0xf9   : > { %p3349_p1 = pnand %p3347_p13, %p3678_p0 }
  0xfb   : > { %p3350_p6 = pneg %p3349_p1 }
  0xfd   : > { %p3355_p9 = pnand %p3353_p5, %p3350_p6 }
  0xff   : > { %3358 = shalt.err (!%p3355_p9)
}
 0x100   : > { %s3359_s28 = scalar_lea.vmem %s725_s3, 16  ;;  %s3366_s11 = scalar_lea.vmem %s725_s3, 32 }
 0x101   : > { %p3360_p10 = scmp.ne.s32.totalorder %s725_s3, %s3359_s28  ;;  %p3367_p4 = scmp.lt.s32.totalorder %s725_s3, %s725_s3 }
 0x102   : > { %p3368_p7 = scmp.lt.s32.totalorder %s3366_s11, %s3359_s28 }
 0x103   : > { %p3362_p2 = pnand %p3360_p10, %p3678_p0 }
 0x104   : > { %p3369_p8 = por %p3368_p7, %p3367_p4 }
 0x105   : > { %p3363_p3 = pneg %p3362_p2 }
 0x107   : > { %p3370_p11 = pnand %p3369_p8, %p3363_p3 }
 0x109   : > { %3373 = shalt.err (!%p3370_p11)
}
 0x10a   : > { %2992 = dma.hbm_to_vmem [thread:$0]  (!%p3662_p12), %s4217_s20, 16, %s725_s3, [#allocation17]  }
 0x10b   : > { %p4274_p13 = scmp.ne.s32.totalorder %s4265_s4, 0 }
 0x10c   : > { %p4275_p1 = scmp.eq.s32.totalorder (!%p4274_p13), %s3626_s23, 0 }
 0x10d   : > { %775 = sbr.rel (%p4274_p13) target bundleno = 3305 (0xce9), region = 116 }
 0x114   : > { %3419 = dma.done.wait (%p4275_p1), [#allocation5], 16   ;;  %p4276_p0 = pmov %p4275_p1 }
 0x116   : > { %3421 = vsyncadd (%p4276_p0), [#allocation5], 4294967280  ;;  %p4277_p6 = pmov %p4276_p0 }
 0x117   : > { %p4278_p5 = pmov %p4276_p0 }
 0x118   : > { %3423 = dma.done.wait (%p4277_p6), [#allocation8], 32  }
 0x119   : > { %3425 = vsyncadd (%p4278_p5), [#allocation8], 4294967264  ;;  %p4279_p9 = pmov %p4276_p0 }
 0x11a   : > { %p4280_p12 = pmov %p4276_p0 }
 0x11b   : > { %3427 = dma.done.wait (%p4279_p9), [#allocation11], 32  }
 0x11c   : > { %3429 = vsyncadd (%p4280_p12), [#allocation11], 4294967264  ;;  %p4281_p10 = pmov %p4276_p0 }
 0x11d   : > { %p4282_p2 = pmov %p4276_p0 }
 0x11e   : > { %3431 = dma.done.wait (%p4281_p10), [#allocation14], 32  }
 0x11f   : > { %3433 = vsyncadd (%p4282_p2), [#allocation14], 4294967264  ;;  %p4283_p3 = pmov %p4276_p0 }
 0x120   : > { %p4284_p4 = pmov %p4276_p0 }
 0x121   : > { %3435 = dma.done.wait (%p4283_p3), [#allocation17], 32  }
 0x122   : > { %3437 = vsyncadd (%p4284_p4), [#allocation17], 4294967264  ;;  %p885_p7 = scmp.lt.s32.totalorder %s3626_s23, 1  ;;  %v3467_v1 = vmov 0.0   ;;  %v1116_v2 = vlaneseq  ;;  %vm3468_vm0 = vmmov 0   ;;  %s4285_s25 = sld [smem:[#allocation40_spill]] }
 0x123   : > { %2775 = vmatprep.subr.bf16.mxu1 %v3467_v1  ;;  %2767 = vmatprep.subr.bf16.mxu0 %v3467_v1  ;;  %s4286_s24 = sld [smem:[#allocation34_spill]]  ;;  %s4287_s6 = sld [smem:[#allocation38_spill]]  ;;  %vm932_vm1 = vcmask 261120   ;;  %v2654_v13 = vld [vmem:[#allocation7] ss:$0 sm:$0xff]  ;;  %vm1121_vm2 = vcmask 64512  }
 0x124   : > { %2779 = vmatprep.mubr.msk.bf16.mxu1 %vm3468_vm0, %v3467_v1  ;;  %s3878_s4 = scalar_select %p885_p7, %s3626_s23, 1  ;;  %2771 = vmatprep.mubr.msk.bf16.mxu0 %vm3468_vm0, %v3467_v1  ;;  %v3882_v3 = vshrl.u32 %v1116_v2, 7  ;;  %v2650_v15 = vld [vmem:[#allocation4] ss:$0 sm:$0xff]  ;;  %vm1168_vm3 = vcmask 130048   ;;  %vm1348_vm4 = vcmask 130112  }
 0x125   : > { %s4289_s13 = sld [smem:[#allocation36_spill]]  ;;  %s4290_s0 = sld [smem:[#allocation35_spill]]  ;;  %v2659_v49 = vld [vmem:[#allocation9] ss:$0 sm:$0xff]  ;;  %vm1463_vm5 = vcmask 195712   ;;  %vm1578_vm6 = vcmask 261312  }
 0x126   : > { %s2709_s7 = sshll.u32 %s3878_s4, 3  ;;  %s2644_s30 = sshll.u32 %s3878_s4, 2  ;;  %v1118_v7 = vsub.s32 0, %v3882_v3 }
 0x127   : > { %s3469_s5 = smov 112   ;;  %s4291_s28 = sld [smem:[#allocation42_spill]] }
 0x128   : > { %v3068_v4 = vld [vmem:[%s4285_s25] sm:$0xff]   ;;  %v3069_v5 = vld [vmem:[%s4285_s25 + $0x8] sm:$0xff]   ;;  %s3472_s3 = smov 8   ;;  %s4293_s27 = sld [smem:[#allocation37_spill]] }
 0x129   : > { %s887_s8 = scalar_lea.vmem %s4286_s24, %s3878_s4  ;;  %2776 = vmatpush3.bf16.msra.mxu1 %v3068_v4  ;;  %s4288_s29 = smov %s4287_s6  ;;  %v3070_v6 = vld [vmem:[%s4287_s6] sm:$0xff]  }
 0x12a   : > { %2777 = vmatprep.subr.bf16.mxu1 %v3467_v1  ;;  %v3906_v8 = vld [vmem:[%s887_s8] sm:$0x1]  ;;  %2768 = vmatpush3.bf16.msra.mxu0 %v3070_v6  ;;  %v3072_v11 = vld [vmem:[%s4288_s29 + $0x8] sm:$0xff]   ;;  %s3470_s8 = smov 120   ;;  %s4295_s6 = sld [smem:[#allocation32_spill]] }
 0x12b   : > { %s896_s26 = scalar_lea.vmem %s4289_s13, %s2709_s7  ;;  %s891_s24 = scalar_lea.vmem %s4290_s0, %s2644_s30  ;;  %v3914_v9 = vrot.slane %v3906_v8, %v1118_v7  ;;  %2769 = vmatprep.subr.bf16.mxu0 %v3467_v1  ;;  %v2649_v40 = vadd.f32 -1.0, %v3906_v8 }
 0x12c   : > { %v3071_v10 = vld [vmem:[%s896_s26] sm:$0xff]   ;;  %s3471_s30 = smov 104   ;;  %s3473_s13 = smov 16  }
 0x12d   : > { %2778 = vmatpush3.bf16.msra.mxu1 %v3069_v5  ;;  %v3920_v12 = vld [vmem:[%s891_s24] sm:$0xf]  ;;  %s4292_s11 = smov %s4291_s28  ;;  %v905_v41 = vmul.f32 1e+30, %v2649_v40  ;;  %s2706_s4 = sshll.u32 %s3626_s23, 7 }
 0x12e   : > { %2791 = vmatprep.subr.bf16.mxu1 %v3467_v1  ;;  %2770 = vmatpush3.bf16.msra.mxu0 %v3072_v11  ;;  %v3073_v29 = vld [vmem:[%s4291_s28] sm:$0xff]   ;;  %v3074_v30 = vld [vmem:[%s4292_s11 + $0x8] sm:$0xff]   ;;  %s3474_s28 = smov 24   ;;  %s901_s1 = scalar_lea.vmem %s4293_s27, %s2709_s7 }
 0x12f   : > { %2783 = vmatprep.subr.bf16.mxu0 %v3467_v1  ;;  %v3971_v42 = vrot.slane %v905_v41, %v1118_v7  ;;  %s4294_s27 = sld [smem:[#allocation27_spill]]  ;;  %s3476_s23 = smov [#allocation19]  }
 0x130   : > { %2780 = vmatmul.mubr.msk.bf16.vlgmr.msra.gmra.mrb[0].mxu1 %vm932_vm1, %v3071_v10  ;;  %p4297_p11 = scmp.ne.s32.totalorder %s4295_s6, 0 }
 0x131   : > { %2793 = vmatprep.mubr.msk.bf16.mxu1 %vm3468_vm0, %v3467_v1  ;;  %2772 = vmatmul.mubr.msk.bf16.vlgmr.msra.gmra.mrb[0].mxu0 %vm932_vm1, %v3920_v12 }
 0x132   : > { %2787 = vmatprep.mubr.msk.bf16.mxu0 %vm3468_vm0, %v3467_v1  ;;  %2784 = vmatpush3.bf16.msra.mxu0 %v3073_v29 }
 0x133   : > { %2785 = vmatprep.subr.bf16.mxu0 %v3467_v1 }
 0x136   : > { %2786 = vmatpush3.bf16.msra.mxu0 %v3074_v30 }
 0x137   : > { %2797 = vmatprep.subr.bf16.mxu0 %v3467_v1 }
 0x139   : > { %2788 = vmatmul.mubr.msk.bf16.vlgmr.msra.gmra.mrb[4].mxu0 %vm932_vm1, %v3071_v10 }
 0x13a   : > { %2799 = vmatprep.mubr.msk.bf16.mxu0 %vm3468_vm0, %v3467_v1 }
 0x203   : > { %v1042_v14 = vpop.f32.mrb[0].mxu1 }
 0x204   : > { %v2781_v16 = vpop.f32.mrb[1].mxu1  ;;  %v970_v18 = vpop.f32.mrb[0].mxu0  ;;  %v1043_v19 = vadd.f32 %v2654_v13, %v1042_v14 }
 0x205   : > { %v1045_v17 = vpop.f32.mrb[2].mxu1  ;;  %v971_v22 = vadd.f32 %v2650_v15, %v970_v18  ;;  %v2773_v23 = vpop.f32.mrb[1].mxu0 }
 0x206   : > { %v1046_v20 = vadd.f32 %v2654_v13, %v1045_v17  ;;  %v2782_v21 = vpop.f32.mrb[3].mxu1  ;;  %v973_v24 = vpop.f32.mrb[2].mxu0 }
 0x207   : > { %v2774_v26 = vpop.f32.mrb[3].mxu0  ;;  %v976_v27 = vpack.c.bf16 %v971_v22, %v971_v22 }
 0x208   : > { %v1049_v25 = vpack.c.bf16 %v1046_v20, %v1043_v19 }
 0x20a   : > { %1352 = vrot.lane.b32.xlu1 %v1049_v25, %s3469_s5  ;;  %1236 = vrot.lane.b32.xlu0 %v1049_v25, %s3470_s8  ;;  %v1126_v28 = vsel %vm1121_vm2, %v1049_v25, 0 }
 0x20b   : > { %2792 = vmatpush3.bf16.xpose.msra.mxu1 %v1126_v28 }
 0x20c   : > { %2803 = vmatprep.subr.bf16.mxu1 %v3467_v1  ;;  %v1107_v50 = vpop.f32.mrb[4].mxu0 }
 0x20d   : > { %v1108_v51 = vadd.f32 %v2659_v49, %v1107_v50  ;;  %v2789_v52 = vpop.f32.mrb[5].mxu0 }
 0x20e   : > { %1350 = vrot.lane.b32.xlu1 %v976_v27, %s3469_s5  ;;  %1233 = vrot.lane.b32.xlu0 %v976_v27, %s3470_s8  ;;  %v1110_v53 = vpop.f32.mrb[6].mxu0 }
 0x20f   : > { %v1111_v54 = vadd.f32 %v2659_v49, %v1110_v53  ;;  %v2790_v55 = vpop.f32.mrb[7].mxu0 }
 0x211   : > { %v1114_v56 = vpack.c.bf16 %v1111_v54, %v1108_v51 }
 0x212   : > { %1465 = vrot.lane.b32.xlu1 %v976_v27, %s3471_s30  ;;  %1467 = vrot.lane.b32.xlu0 %v1049_v25, %s3471_s30 }
 0x213   : > { %2794 = vmatmul.mubr.msk.bf16.vlgmr.msra.gmra.mrb[4].mxu1 %vm1121_vm2, %v976_v27  ;;  %2798 = vmatpush3.bf16.msra.mxu0 %v1114_v56 }
 0x214   : > { %2805 = vmatprep.mubr.msk.bf16.mxu1 %vm3468_vm0, %v3467_v1  ;;  %2809 = vmatprep.subr.bf16.mxu0 %v3467_v1 }
 0x27c   : > { %v1237_v31 = vpop.permute.xlu0 %1236  ;;  %v1353_v33 = vpop.permute.xlu1 %1352 }
 0x27d   : > { %v1242_v32 = vsel %vm1121_vm2, %v1237_v31, 0  ;;  %v1358_v35 = vsel %vm1121_vm2, %v1353_v33, 0 }
 0x27e   : > { %2804 = vmatpush3.bf16.xpose.msra.mxu1 %v1242_v32 }
 0x27f   : > { %2815 = vmatprep.subr.bf16.mxu1 %v3467_v1 }
 0x280   : > { %v1234_v34 = vpop.permute.xlu0 %1233  ;;  %v1351_v37 = vpop.permute.xlu1 %1350 }
 0x284   : > { %v1468_v36 = vpop.permute.xlu0 %1467  ;;  %v1466_v39 = vpop.permute.xlu1 %1465 }
 0x285   : > { %2806 = vmatmul.mubr.msk.bf16.vlgmr.msra.gmra.mrb[8].mxu1 %vm1121_vm2, %v1234_v34  ;;  %v1473_v38 = vsel %vm1121_vm2, %v1468_v36, 0 }
 0x286   : > { %2816 = vmatpush3.bf16.xpose.msra.mxu1 %v1358_v35  ;;  %2817 = vmatprep.mubr.msk.bf16.mxu1 %vm3468_vm0, %v3467_v1 }
 0x287   : > { %2827 = vmatprep.subr.bf16.mxu1 %v3467_v1 }
 0x28d   : > { %2818 = vmatmul.mubr.msk.bf16.vlgmr.msra.gmra.mrb[12].mxu1 %vm1121_vm2, %v1351_v37 }
 0x28e   : > { %2828 = vmatpush3.bf16.xpose.msra.mxu1 %v1473_v38  ;;  %2829 = vmatprep.mubr.msk.bf16.mxu1 %vm3468_vm0, %v3467_v1 }
 0x28f   : > { %2839 = vmatprep.subr.bf16.mxu1 %v3467_v1 }
 0x295   : > { %2830 = vmatmul.mubr.msk.bf16.vlgmr.msra.gmra.mrb[16].mxu1 %vm1121_vm2, %v1466_v39 }
 0x296   : > { %2843 = vmatprep.mubr.msk.bf16.mxu1 %vm3468_vm0, %v3467_v1 }
 0x2e6   : > { %v1162_v43 = vpop.f32.mrb[4].mxu1 }
 0x2e7   : > { %v1163_v44 = vadd.f32 %v1162_v43, %v3971_v42  ;;  %v2795_v45 = vpop.f32.mrb[5].mxu1 }
 0x2e8   : > { %v1165_v46 = vpop.f32.mrb[6].mxu1 }
 0x2e9   : > { %v2796_v47 = vpop.f32.mrb[7].mxu1  ;;  %v1169_v48 = vsel %vm1168_vm3, %v1163_v44, -inf }
 0x2ea   : > { %1170 = vmax.xlane.f32.xlu0 %v1169_v48 }
 0x358   : > { %v1278_v57 = vpop.f32.mrb[8].mxu1 }
 0x359   : > { %v1279_v58 = vadd.f32 %v1278_v57, %v3971_v42  ;;  %v2807_v59 = vpop.f32.mrb[9].mxu1 }
 0x35a   : > { %v1281_v60 = vpop.f32.mrb[10].mxu1 }
 0x35b   : > { %v2808_v61 = vpop.f32.mrb[11].mxu1  ;;  %v1284_v62 = vsel %vm1168_vm3, %v1279_v58, -inf }
 0x35c   : > { %1285 = vmax.xlane.f32.xlu1 %v1284_v62 }
 0x360   : > { %v1394_v63 = vpop.f32.mrb[12].mxu1 }
 0x361   : > { %v1395_v0 = vadd.f32 %v1394_v63, %v3971_v42  ;;  %v2819_v2 = vpop.f32.mrb[13].mxu1 }
 0x362   : > { %v1397_v3 = vpop.f32.mrb[14].mxu1 }
 0x363   : > { %v2820_v4 = vpop.f32.mrb[15].mxu1  ;;  %v1400_v5 = vsel %vm1168_vm3, %v1395_v0, -inf  ;;  %v3075_v3 = vld [vmem:[%s4207_s10] sm:$0xff]  }
 0x364   : > { %1401 = vmax.xlane.f32.xlu0 %v1400_v5  ;;  %2840 = vmatpush3.bf16.msra.mxu1 %v3075_v3  ;;  %v3076_v4 = vld [vmem:[%s4207_s10 + $0x8] sm:$0xff]  }
 0x365   : > { %2841 = vmatprep.subr.bf16.mxu1 %v3467_v1 }
 0x368   : > { %v1509_v6 = vpop.f32.mrb[16].mxu1  ;;  %2842 = vmatpush3.bf16.msra.mxu1 %v3076_v4 }
 0x369   : > { %v1510_v7 = vadd.f32 %v1509_v6, %v3971_v42  ;;  %v2831_v8 = vpop.f32.mrb[17].mxu1  ;;  %2855 = vmatprep.subr.bf16.mxu1 %v3467_v1 }
 0x36a   : > { %v1512_v10 = vpop.f32.mrb[18].mxu1 }
 0x36b   : > { %v2832_v11 = vpop.f32.mrb[19].mxu1  ;;  %v1515_v13 = vsel %vm1168_vm3, %v1510_v7, -inf  ;;  %v3078_v10 = vld [vmem:[%s4209_s12] sm:$0xff]  }
 0x36c   : > { %1516 = vmax.xlane.f32.xlu0 %v1515_v13 }
 0x377   : > { %v1171_v14 = vpop.xlane.xlu0 %1170 }
 0x378   : > { %v1172_v15 = vsub.f32 %v1163_v44, %v1171_v14 }
 0x37a   : > { %v1173_v16 = vmul.f32 1.442695, %v1172_v15 }
 0x37c   : > { %3086 = vpow2.f32 %v1173_v16  ;;  %v3080_v16 = vld [vmem:[%s4209_s12 + $0x8] sm:$0xff]  }
 0x386   : > { %v3087_v17 = vpop.eup %3086 }
 0x387   : > { %v1175_v18 = vsel %vm1168_vm3, %v3087_v17, 0.0 }
 0x388   : > { %1176 = vadd.xlane.f32.xlu1 %v1175_v18 }
 0x399   : > { %1298 = vrot.lane.b32.xlu1 %v1114_v56, %s3470_s8 }
 0x3e9   : > { %v1286_v19 = vpop.xlane.xlu1 %1285 }
 0x3ea   : > { %v1287_v20 = vsub.f32 %v1279_v58, %v1286_v19 }
 0x3ec   : > { %v1288_v21 = vmul.f32 1.442695, %v1287_v20 }
 0x3ee   : > { %3088 = vpow2.f32 %v1288_v21  ;;  %v3077_v21 = vld [vmem:[%s4211_s14] sm:$0xff]  }
 0x3f1   : > { %v1402_v22 = vpop.xlane.xlu0 %1401 }
 0x3f2   : > { %v1403_v23 = vsub.f32 %v1395_v0, %v1402_v22 }
 0x3f4   : > { %v1404_v24 = vmul.f32 1.442695, %v1403_v23  ;;  %v1648_v23 = vld [vmem:[%s901_s1] sm:$0xff]   ;;  %s882_s1 = sand.u32 1, %s4294_s27  }
 0x3f5   : > { %s2643_s26 = sshll.u32 %s882_s1, 3  ;;  %s2428_s24 = scalar_lea.sflag [#allocation6], %s882_s1 }
 0x3f6   : > { %3090 = vpow2.f32 %v1404_v24  ;;  %v3079_v24 = vld [vmem:[%s4211_s14 + $0x8] sm:$0xff]   ;;  %s884_s7 = scalar_lea.vmem [#allocation19], %s2643_s26 }
 0x3f7   : > { %s2441_s2 = sshll.u32 %s884_s7, 4  ;;  %s4156_s2 = int_to_ptr.vmem [resolvable:$true] %s2441_s2 }
 0x3f8   : > { %v3089_v25 = vpop.eup %3088 }
 0x3f9   : > { %v1517_v26 = vpop.xlane.xlu0 %1516  ;;  %v1290_v27 = vsel %vm1168_vm3, %v3089_v25, 0.0 }
 0x3fa   : > { %v1518_v28 = vsub.f32 %v1510_v7, %v1517_v26  ;;  %1291 = vadd.xlane.f32.xlu0 %v1290_v27 }
 0x3fc   : > { %v1519_v29 = vmul.f32 1.442695, %v1518_v28 }
 0x3fe   : > { %3092 = vpow2.f32 %v1519_v29 }
 0x400   : > { %v3091_v30 = vpop.eup %3090 }
 0x401   : > { %v1406_v31 = vsel %vm1168_vm3, %v3091_v30, 0.0 }
 0x402   : > { %1407 = vadd.xlane.f32.xlu1 %v1406_v31 }
 0x408   : > { %v3093_v32 = vpop.eup %3092 }
 0x409   : > { %v1521_v33 = vsel %vm1168_vm3, %v3093_v32, 0.0 }
 0x40a   : > { %1522 = vadd.xlane.f32.xlu0 %v1521_v33 }
 0x413   : > { %1528 = vrot.lane.b32.xlu1 %v1114_v56, %s3471_s30 }
 0x415   : > { %v1177_v34 = vpop.xlane.xlu1 %1176 }
 0x416   : > { %3094 = vrcp.f32 %v1177_v34 }
 0x419   : > { %v1299_v39 = vpop.permute.xlu1 %1298 }
 0x420   : > { %v3095_v35 = vpop.eup %3094  ;;  %1413 = vrot.lane.b32.xlu0 %v1114_v56, %s3469_s5 }
 0x421   : > { %v1179_v36 = vmul.f32 %v3095_v35, %v3087_v17 }
 0x423   : > { %v1186_v37 = vmul.f32 %v3914_v9, %v1179_v36  ;;  %v2679_v36 = vld [vmem:[#allocation13] ss:$0 sm:$0xff] }
 0x425   : > { %v1187_v38 = vpack.c.bf16 %v1186_v37, %v1186_v37 }
 0x427   : > { %2800 = vmatmul.mubr.msk.bf16.vlgmr.msra.gmra.mrb[8].mxu0 %vm1168_vm3, %v1187_v38 }
 0x428   : > { %2810 = vmatpush3.bf16.msra.mxu0 %v1299_v39  ;;  %2811 = vmatprep.mubr.msk.bf16.mxu0 %vm3468_vm0, %v3467_v1 }
 0x429   : > { %2821 = vmatprep.subr.bf16.mxu0 %v3467_v1 }
 0x487   : > { %v1292_v40 = vpop.xlane.xlu0 %1291 }
 0x488   : > { %3096 = vrcp.f32 %v1292_v40 }
 0x48f   : > { %v1408_v41 = vpop.xlane.xlu1 %1407 }
 0x490   : > { %3098 = vrcp.f32 %v1408_v41 }
 0x492   : > { %v3097_v43 = vpop.eup %3096 }
 0x493   : > { %v1294_v44 = vmul.f32 %v3097_v43, %v3089_v25  ;;  %v1529_v53 = vpop.permute.xlu1 %1528  ;;  %v2675_v25 = vld [vmem:[#allocation12] ss:$0 sm:$0xff] }
 0x495   : > { %v1295_v45 = vmul.f32 %v1294_v44, %v3914_v9 }
 0x497   : > { %v1523_v46 = vpop.xlane.xlu0 %1522  ;;  %v1296_v47 = vpack.c.bf16 %v1295_v45, %v1295_v45 }
 0x498   : > { %3100 = vrcp.f32 %v1523_v46  ;;  %v3081_v46 = vld [vmem:[%s4213_s16] sm:$0xff]  }
 0x499   : > { %2812 = vmatmul.mubr.msk.bf16.vlgmr.msra.gmra.mrb[12].mxu0 %vm1168_vm3, %v1296_v47  ;;  %v3082_v47 = vld [vmem:[%s4213_s16 + $0x8] sm:$0xff]  }
 0x49a   : > { %v3099_v48 = vpop.eup %3098  ;;  %2823 = vmatprep.mubr.msk.bf16.mxu0 %vm3468_vm0, %v3467_v1 }
 0x49b   : > { %v1410_v49 = vmul.f32 %v3099_v48, %v3091_v30  ;;  %v1414_v50 = vpop.permute.xlu0 %1413 }
 0x49c   : > { %2822 = vmatpush3.bf16.msra.mxu0 %v1414_v50 }
 0x49d   : > { %2833 = vmatprep.subr.bf16.mxu0 %v3467_v1  ;;  %v1411_v51 = vmul.f32 %v1410_v49, %v3914_v9 }
 0x49f   : > { %v1412_v52 = vpack.c.bf16 %v1411_v51, %v1411_v51 }
 0x4a1   : > { %2824 = vmatmul.mubr.msk.bf16.vlgmr.msra.gmra.mrb[16].mxu0 %vm1168_vm3, %v1412_v52 }
 0x4a2   : > { %v3101_v54 = vpop.eup %3100  ;;  %2834 = vmatpush3.bf16.msra.mxu0 %v1529_v53  ;;  %2835 = vmatprep.mubr.msk.bf16.mxu0 %vm3468_vm0, %v3467_v1 }
 0x4a3   : > { %v1525_v55 = vmul.f32 %v3101_v54, %v3093_v32  ;;  %2847 = vmatprep.subr.bf16.mxu0 %v3467_v1 }
 0x4a5   : > { %v1526_v56 = vmul.f32 %v1525_v55, %v3914_v9 }
 0x4a7   : > { %v1527_v57 = vpack.c.bf16 %v1526_v56, %v1526_v56 }
 0x4a9   : > { %2836 = vmatmul.mubr.msk.bf16.vlgmr.msra.gmra.mrb[20].mxu0 %vm1168_vm3, %v1527_v57 }
 0x4aa   : > { %2851 = vmatprep.mubr.msk.bf16.mxu0 %vm3468_vm0, %v3467_v1  ;;  %2848 = vmatpush3.bf16.msra.mxu0 %v3078_v10 }
 0x4ab   : > { %2849 = vmatprep.subr.bf16.mxu0 %v3467_v1 }
 0x4ae   : > { %2850 = vmatpush3.bf16.msra.mxu0 %v3080_v16 }
 0x4af   : > { %2863 = vmatprep.subr.bf16.mxu0 %v3467_v1 }
 0x4b1   : > { %2852 = vmatmul.mubr.msk.bf16.vlgmr.msra.gmra.mrb[24].mxu0 %vm932_vm1, %v3920_v12 }
 0x4b2   : > { %2867 = vmatprep.mubr.msk.bf16.mxu0 %vm3468_vm0, %v3467_v1  ;;  %2864 = vmatpush3.bf16.msra.mxu0 %v3081_v46 }
 0x4b3   : > { %2865 = vmatprep.subr.bf16.mxu0 %v3467_v1 }
 0x4b6   : > { %2866 = vmatpush3.bf16.msra.mxu0 %v3082_v47 }
 0x4b7   : > { %2877 = vmatprep.subr.bf16.mxu0 %v3467_v1 }
 0x4b9   : > { %2868 = vmatmul.mubr.msk.bf16.vlgmr.msra.gmra.mrb[28].mxu0 %vm932_vm1, %v1648_v23 }
 0x4ba   : > { %2879 = vmatprep.mubr.msk.bf16.mxu0 %vm3468_vm0, %v3467_v1 }
 0x4fa   : > { %v1225_v58 = vpop.f32.mrb[8].mxu0 }
 0x4fb   : > { %1231 = vst.msk [vmem:[#allocation2] sm:$0xff] %vm1121_vm2, %v1225_v58  ;;  %v2801_v59 = vpop.f32.mrb[9].mxu0 }
 0x4fc   : > { %v1228_v60 = vpop.f32.mrb[10].mxu0 }
 0x4fd   : > { %v2802_v61 = vpop.f32.mrb[11].mxu0 }
 0x56c   : > { %v1338_v62 = vpop.f32.mrb[12].mxu0 }
 0x56d   : > { %1345 = vrot.lane.b32.xlu1 %v1338_v62, %s3472_s3  ;;  %v2813_v63 = vpop.f32.mrb[13].mxu0 }
 0x56e   : > { %v1341_v0 = vpop.f32.mrb[14].mxu0  ;;  %v2684_v63 = vld [vmem:[#allocation15] ss:$0 sm:$0xff] }
 0x56f   : > { %v2814_v2 = vpop.f32.mrb[15].mxu0 }
 0x574   : > { %v1453_v5 = vpop.f32.mrb[16].mxu0 }
 0x575   : > { %1460 = vrot.lane.b32.xlu0 %v1453_v5, %s3473_s13  ;;  %v2825_v6 = vpop.f32.mrb[17].mxu0 }
 0x576   : > { %v1456_v7 = vpop.f32.mrb[18].mxu0 }
 0x577   : > { %v2826_v8 = vpop.f32.mrb[19].mxu0 }
 0x57c   : > { %v1568_v11 = vpop.f32.mrb[20].mxu0 }
 0x57d   : > { %1575 = vrot.lane.b32.xlu1 %v1568_v11, %s3474_s28  ;;  %v2837_v13 = vpop.f32.mrb[21].mxu0 }
 0x57e   : > { %v1571_v14 = vpop.f32.mrb[22].mxu0 }
 0x57f   : > { %v2838_v15 = vpop.f32.mrb[23].mxu0 }
 0x584   : > { %v1707_v26 = vpop.f32.mrb[24].mxu0 }
 0x585   : > { %v1708_v27 = vadd.f32 %v2675_v25, %v1707_v26  ;;  %v2853_v28 = vpop.f32.mrb[25].mxu0 }
 0x586   : > { %v1710_v29 = vpop.f32.mrb[26].mxu0 }
 0x587   : > { %v1713_v30 = vpack.c.bf16 %v1708_v27, %v1708_v27  ;;  %v2854_v31 = vpop.f32.mrb[27].mxu0 }
 0x589   : > { %1956 = vrot.lane.b32.xlu1 %v1713_v30, %s3470_s8 }
 0x58c   : > { %v1844_v0 = vpop.f32.mrb[28].mxu0 }
 0x58d   : > { %2072 = vrot.lane.b32.xlu1 %v1713_v30, %s3469_s5  ;;  %v1845_v2 = vadd.f32 %v2684_v63, %v1844_v0  ;;  %v2869_v3 = vpop.f32.mrb[29].mxu0 }
 0x58e   : > { %v1847_v4 = vpop.f32.mrb[30].mxu0 }
 0x58f   : > { %v1848_v5 = vadd.f32 %v2684_v63, %v1847_v4  ;;  %v2870_v6 = vpop.f32.mrb[31].mxu0 }
 0x591   : > { %2186 = vrot.lane.b32.xlu1 %v1713_v30, %s3471_s30  ;;  %v1851_v7 = vpack.c.bf16 %v1848_v5, %v1845_v2 }
 0x593   : > { %2878 = vmatpush3.bf16.msra.mxu0 %v1851_v7 }
 0x594   : > { %2889 = vmatprep.subr.bf16.mxu0 %v3467_v1 }
 0x5df   : > { %v1346_v17 = vpop.permute.xlu1 %1345 }
 0x5e0   : > { %1349 = vst.msk [vmem:[#allocation2] sm:$0xff] %vm1348_vm4, %v1346_v17 }
 0x5e7   : > { %v1461_v18 = vpop.permute.xlu0 %1460 }
 0x5e8   : > { %1464 = vst.msk [vmem:[#allocation2] sm:$0xff] %vm1463_vm5, %v1461_v18 }
 0x5ef   : > { %v1576_v19 = vpop.permute.xlu1 %1575 }
 0x5f0   : > { %1579 = vst.msk [vmem:[#allocation2] sm:$0xff] %vm1578_vm6, %v1576_v19 }
 0x5f7   : > { %v1580_v20 = vld [vmem:[#allocation2] sm:$0xff] }
 0x5f8   : > { %v1581_v22 = vpack.c.bf16 %v1580_v20, %v1580_v20 }
 0x5fa   : > { %2844 = vmatmul.mubr.msk.bf16.vlgmr.msra.gmra.mrb[20].mxu1 %vm932_vm1, %v1581_v22 }
 0x5fb   : > { %2856 = vmatpush3.bf16.msra.mxu1 %v3077_v21  ;;  %2859 = vmatprep.mubr.msk.bf16.mxu1 %vm3468_vm0, %v3467_v1  ;;  %v1957_v51 = vpop.permute.xlu1 %1956 }
 0x5fc   : > { %2857 = vmatprep.subr.bf16.mxu1 %v3467_v1 }
 0x5ff   : > { %2858 = vmatpush3.bf16.msra.mxu1 %v3079_v24  ;;  %v2073_v54 = vpop.permute.xlu1 %2072 }
 0x600   : > { %2871 = vmatprep.subr.bf16.mxu1 %v3467_v1 }
 0x602   : > { %2860 = vmatmul.mubr.msk.bf16.vlgmr.msra.gmra.mrb[24].mxu1 %vm932_vm1, %v1648_v23 }
 0x603   : > { %2873 = vmatprep.mubr.msk.bf16.mxu1 %vm3468_vm0, %v3467_v1  ;;  %v2187_v56 = vpop.permute.xlu1 %2186 }
 0x6cd   : > { %v4057_v32 = vpop.f32.mrb[20].mxu1 }
 0x6ce   : > { %v2845_v33 = vpop.f32.mrb[21].mxu1 }
 0x6cf   : > { %v1645_v34 = vpop.f32.mrb[22].mxu1 }
 0x6d0   : > { %v2846_v35 = vpop.f32.mrb[23].mxu1 }
 0x6d5   : > { %v1779_v37 = vpop.f32.mrb[24].mxu1 }
 0x6d6   : > { %v2861_v38 = vpop.f32.mrb[25].mxu1  ;;  %v1780_v40 = vadd.f32 %v2679_v36, %v1779_v37 }
 0x6d7   : > { %v1782_v39 = vpop.f32.mrb[26].mxu1 }
 0x6d8   : > { %v1783_v41 = vadd.f32 %v2679_v36, %v1782_v39  ;;  %v2862_v43 = vpop.f32.mrb[27].mxu1 }
 0x6da   : > { %v1786_v44 = vpack.c.bf16 %v1783_v41, %v1780_v40 }
 0x6dc   : > { %1959 = vrot.lane.b32.xlu0 %v1786_v44, %s3470_s8  ;;  %v1856_v45 = vsel %vm1121_vm2, %v1786_v44, 0 }
 0x6dd   : > { %2872 = vmatpush3.bf16.xpose.msra.mxu1 %v1856_v45 }
 0x6de   : > { %2883 = vmatprep.subr.bf16.mxu1 %v3467_v1 }
 0x6e0   : > { %2074 = vrot.lane.b32.xlu0 %v1786_v44, %s3469_s5 }
 0x6e4   : > { %2188 = vrot.lane.b32.xlu0 %v1786_v44, %s3471_s30  ;;  %2874 = vmatmul.mubr.msk.bf16.vlgmr.msra.gmra.mrb[28].mxu1 %vm1121_vm2, %v1713_v30 }
 0x6e5   : > { %2885 = vmatprep.mubr.msk.bf16.mxu1 %vm3468_vm0, %v3467_v1 }
 0x74e   : > { %v1960_v48 = vpop.permute.xlu0 %1959 }
 0x74f   : > { %v1965_v49 = vsel %vm1121_vm2, %v1960_v48, 0 }
 0x750   : > { %2884 = vmatpush3.bf16.xpose.msra.mxu1 %v1965_v49 }
 0x751   : > { %2895 = vmatprep.subr.bf16.mxu1 %v3467_v1 }
 0x752   : > { %v2075_v50 = vpop.permute.xlu0 %2074 }
 0x753   : > { %v2080_v52 = vsel %vm1121_vm2, %v2075_v50, 0 }
 0x756   : > { %v2189_v53 = vpop.permute.xlu0 %2188 }
 0x757   : > { %2886 = vmatmul.mubr.msk.bf16.vlgmr.msra.gmra.mrb[32].mxu1 %vm1121_vm2, %v1957_v51  ;;  %v2194_v55 = vsel %vm1121_vm2, %v2189_v53, 0 }
 0x758   : > { %2896 = vmatpush3.bf16.xpose.msra.mxu1 %v2080_v52  ;;  %2897 = vmatprep.mubr.msk.bf16.mxu1 %vm3468_vm0, %v3467_v1 }
 0x759   : > { %2907 = vmatprep.subr.bf16.mxu1 %v3467_v1 }
 0x75f   : > { %2898 = vmatmul.mubr.msk.bf16.vlgmr.msra.gmra.mrb[36].mxu1 %vm1121_vm2, %v2073_v54 }
 0x760   : > { %2908 = vmatpush3.bf16.xpose.msra.mxu1 %v2194_v55  ;;  %2909 = vmatprep.mubr.msk.bf16.mxu1 %vm3468_vm0, %v3467_v1 }
 0x761   : > { %2919 = vmatprep.subr.bf16.mxu1 %v3467_v1 }
 0x767   : > { %2910 = vmatmul.mubr.msk.bf16.vlgmr.msra.gmra.mrb[40].mxu1 %vm1121_vm2, %v2187_v56 }
 0x768   : > { %2923 = vmatprep.mubr.msk.bf16.mxu1 %vm3468_vm0, %v3467_v1 }
 0x7b7   : > { %v1892_v57 = vpop.f32.mrb[28].mxu1 }
 0x7b8   : > { %v1893_v58 = vadd.f32 %v1892_v57, %v3971_v42  ;;  %v2875_v59 = vpop.f32.mrb[29].mxu1 }
 0x7b9   : > { %v1895_v60 = vpop.f32.mrb[30].mxu1 }
 0x7ba   : > { %v2876_v61 = vpop.f32.mrb[31].mxu1  ;;  %v1898_v62 = vsel %vm1168_vm3, %v1893_v58, -inf }
 0x7bb   : > { %1899 = vmax.xlane.f32.xlu0 %v1898_v62 }
 0x82a   : > { %v2001_v8 = vpop.f32.mrb[32].mxu1 }
 0x82b   : > { %v2002_v10 = vadd.f32 %v2001_v8, %v3971_v42  ;;  %v2887_v11 = vpop.f32.mrb[33].mxu1 }
 0x82c   : > { %v2004_v13 = vpop.f32.mrb[34].mxu1 }
 0x82d   : > { %v2888_v14 = vpop.f32.mrb[35].mxu1  ;;  %v2007_v15 = vsel %vm1168_vm3, %v2002_v10, -inf }
 0x82e   : > { %2008 = vmax.xlane.f32.xlu1 %v2007_v15 }
 0x832   : > { %v2116_v16 = vpop.f32.mrb[36].mxu1 }
 0x833   : > { %v2117_v17 = vadd.f32 %v2116_v16, %v3971_v42  ;;  %v2899_v18 = vpop.f32.mrb[37].mxu1 }
 0x834   : > { %v2119_v19 = vpop.f32.mrb[38].mxu1 }
 0x835   : > { %v2900_v20 = vpop.f32.mrb[39].mxu1  ;;  %v2122_v21 = vsel %vm1168_vm3, %v2117_v17, -inf  ;;  %v3083_v19 = vld [vmem:[%s4215_s18] sm:$0xff]  }
 0x836   : > { %2123 = vmax.xlane.f32.xlu0 %v2122_v21  ;;  %2920 = vmatpush3.bf16.msra.mxu1 %v3083_v19 }
 0x837   : > { %2921 = vmatprep.subr.bf16.mxu1 %v3467_v1 }
 0x83a   : > { %v2230_v22 = vpop.f32.mrb[40].mxu1 }
 0x83b   : > { %v2231_v23 = vadd.f32 %v2230_v22, %v3971_v42  ;;  %v2911_v24 = vpop.f32.mrb[41].mxu1 }
 0x83c   : > { %v2233_v25 = vpop.f32.mrb[42].mxu1 }
 0x83d   : > { %v2912_v26 = vpop.f32.mrb[43].mxu1  ;;  %v2236_v27 = vsel %vm1168_vm3, %v2231_v23, -inf }
 0x83e   : > { %2237 = vmax.xlane.f32.xlu0 %v2236_v27 }
 0x848   : > { %v1900_v28 = vpop.xlane.xlu0 %1899 }
 0x849   : > { %v1901_v29 = vsub.f32 %v1893_v58, %v1900_v28 }
 0x84b   : > { %v1902_v30 = vmul.f32 1.442695, %v1901_v29 }
 0x84d   : > { %3102 = vpow2.f32 %v1902_v30 }
 0x857   : > { %v3103_v31 = vpop.eup %3102 }
 0x858   : > { %v1904_v33 = vsel %vm1168_vm3, %v3103_v31, 0.0 }
 0x859   : > { %1905 = vadd.xlane.f32.xlu1 %v1904_v33  ;;  %v2671_v33 = vld [vmem:[#allocation10] ss:$0 sm:$0xff] }
 0x86a   : > { %2021 = vrot.lane.b32.xlu1 %v1851_v7, %s3470_s8  ;;  %s4296_s8 = sld [smem:[#allocation46_spill]] }
 0x8bb   : > { %v2009_v34 = vpop.xlane.xlu1 %2008 }
 0x8bc   : > { %v2010_v35 = vsub.f32 %v2002_v10, %v2009_v34  ;;  %v2696_v34 = vld [vmem:[#allocation16] ss:$0 sm:$0xff] }
 0x8be   : > { %v2011_v36 = vmul.f32 1.442695, %v2010_v35  ;;  %v2368_v35 = vunpack.c.l.bf16 %v3920_v12 }
 0x8c0   : > { %3104 = vpow2.f32 %v2011_v36  ;;  %v1643_v36 = vadd.f32 %v2671_v33, %v4057_v32 }
 0x8c3   : > { %v2124_v42 = vpop.xlane.xlu0 %2123 }
 0x8c4   : > { %v2125_v37 = vsub.f32 %v2117_v17, %v2124_v42  ;;  %v2700_v42 = vld [vmem:[#allocation18] ss:$0 sm:$0xff] }
 0x8c6   : > { %v2126_v38 = vmul.f32 1.442695, %v2125_v37 }
 0x8c8   : > { %3106 = vpow2.f32 %v2126_v38  ;;  %v2701_v38 = vld [vmem:[%s4218_s21] ss:$0 sm:$0xff] }
 0x8ca   : > { %v3105_v39 = vpop.eup %3104 }
 0x8cb   : > { %v2238_v40 = vpop.xlane.xlu0 %2237  ;;  %v2013_v41 = vsel %vm1168_vm3, %v3105_v39, 0.0 }
 0x8cc   : > { %v2239_v43 = vsub.f32 %v2231_v23, %v2238_v40  ;;  %2014 = vadd.xlane.f32.xlu0 %v2013_v41 }
 0x8ce   : > { %v2240_v44 = vmul.f32 1.442695, %v2239_v43 }
 0x8d0   : > { %3108 = vpow2.f32 %v2240_v44  ;;  %v2376_v44 = vmul.f32 %v2700_v42, %v1643_v36 }
 0x8d2   : > { %v3107_v45 = vpop.eup %3106 }
 0x8d3   : > { %v2128_v46 = vsel %vm1168_vm3, %v3107_v45, 0.0 }
 0x8d4   : > { %2129 = vadd.xlane.f32.xlu1 %v2128_v46 }
 0x8da   : > { %v3109_v47 = vpop.eup %3108 }
 0x8db   : > { %v2242_v48 = vsel %vm1168_vm3, %v3109_v47, 0.0 }
 0x8dc   : > { %2243 = vadd.xlane.f32.xlu0 %v2242_v48 }
 0x8e5   : > { %2249 = vrot.lane.b32.xlu1 %v1851_v7, %s3471_s30  ;;  %s4154_s30 = scalar_lea.hbm %s4296_s8, %s2706_s4 }
 0x8e6   : > { %v1906_v49 = vpop.xlane.xlu1 %1905 }
 0x8e7   : > { %3110 = vrcp.f32 %v1906_v49  ;;  %v3475_v49 = vmov 0  }
 0x8e8   : > { %3066 = vset.pattern.permute.xlu1 %v3475_v49  ;;  %3067 = vset.pattern.permute.xlu0 %v3475_v49 }
 0x8ea   : > { %v2022_v54 = vpop.permute.xlu1 %2021 }
 0x8f1   : > { %v3111_v50 = vpop.eup %3110 }
 0x8f2   : > { %v1908_v51 = vmul.f32 %v3111_v50, %v3103_v31  ;;  %2135 = vrot.lane.b32.xlu0 %v1851_v7, %s3469_s5  ;;  %v2703_v50 = vld [vmem:[#allocation3] ss:$0 sm:$0xff] }
 0x8f4   : > { %v1909_v52 = vmul.f32 %v1908_v51, %v3914_v9 }
 0x8f6   : > { %v1910_v53 = vpack.c.bf16 %v1909_v52, %v1909_v52 }
 0x8f8   : > { %2880 = vmatmul.mubr.msk.bf16.vlgmr.msra.gmra.mrb[32].mxu0 %vm1168_vm3, %v1910_v53 }
 0x8f9   : > { %2890 = vmatpush3.bf16.msra.mxu0 %v2022_v54  ;;  %2891 = vmatprep.mubr.msk.bf16.mxu0 %vm3468_vm0, %v3467_v1 }
 0x8fa   : > { %2901 = vmatprep.subr.bf16.mxu0 %v3467_v1 }
 0x959   : > { %v2015_v55 = vpop.xlane.xlu0 %2014 }
 0x95a   : > { %3112 = vrcp.f32 %v2015_v55 }
 0x961   : > { %v2130_v56 = vpop.xlane.xlu1 %2129 }
 0x962   : > { %3114 = vrcp.f32 %v2130_v56 }
 0x964   : > { %v3113_v57 = vpop.eup %3112 }
 0x965   : > { %v2017_v58 = vmul.f32 %v3113_v57, %v3105_v39  ;;  %v2250_v4 = vpop.permute.xlu1 %2249  ;;  %v2702_v39 = vld [vmem:[%s4219_s22] ss:$0 sm:$0xff] }
 0x967   : > { %v2018_v59 = vmul.f32 %v2017_v58, %v3914_v9 }
 0x969   : > { %v2244_v60 = vpop.xlane.xlu0 %2243  ;;  %v2019_v61 = vpack.c.bf16 %v2018_v59, %v2018_v59 }
 0x96a   : > { %3116 = vrcp.f32 %v2244_v60 }
 0x96b   : > { %2892 = vmatmul.mubr.msk.bf16.vlgmr.msra.gmra.mrb[36].mxu0 %vm1168_vm3, %v2019_v61 }
 0x96c   : > { %v3115_v62 = vpop.eup %3114  ;;  %2903 = vmatprep.mubr.msk.bf16.mxu0 %vm3468_vm0, %v3467_v1 }
 0x96d   : > { %v2132_v63 = vmul.f32 %v3115_v62, %v3107_v45  ;;  %v2136_v0 = vpop.permute.xlu0 %2135 }
 0x96e   : > { %2902 = vmatpush3.bf16.msra.mxu0 %v2136_v0 }
 0x96f   : > { %2913 = vmatprep.subr.bf16.mxu0 %v3467_v1  ;;  %v2133_v2 = vmul.f32 %v2132_v63, %v3914_v9 }
 0x971   : > { %v2134_v3 = vpack.c.bf16 %v2133_v2, %v2133_v2 }
 0x973   : > { %2904 = vmatmul.mubr.msk.bf16.vlgmr.msra.gmra.mrb[40].mxu0 %vm1168_vm3, %v2134_v3 }
 0x974   : > { %v3117_v5 = vpop.eup %3116  ;;  %2914 = vmatpush3.bf16.msra.mxu0 %v2250_v4  ;;  %2915 = vmatprep.mubr.msk.bf16.mxu0 %vm3468_vm0, %v3467_v1 }
 0x975   : > { %v2246_v6 = vmul.f32 %v3117_v5, %v3109_v47  ;;  %v2393_v47 = vmul.f32 %v2702_v39, %v2368_v35 }
 0x977   : > { %v2247_v7 = vmul.f32 %v2246_v6, %v3914_v9  ;;  %v3084_v9 = vld [vmem:[%s4215_s18 + $0x8] sm:$0xff]  }
 0x978   : > { %2922 = vmatpush3.bf16.msra.mxu1 %v3084_v9 }
 0x979   : > { %v2248_v8 = vpack.c.bf16 %v2247_v7, %v2247_v7 }
 0x97b   : > { %2916 = vmatmul.mubr.msk.bf16.vlgmr.msra.gmra.mrb[44].mxu0 %vm1168_vm3, %v2248_v8 }
 0x9cb   : > { %v1948_v10 = vpop.f32.mrb[32].mxu0 }
 0x9cc   : > { %1954 = vst.msk [vmem:[#allocation2] sm:$0xff] %vm1121_vm2, %v1948_v10  ;;  %v2881_v11 = vpop.f32.mrb[33].mxu0 }
 0x9cd   : > { %v1951_v13 = vpop.f32.mrb[34].mxu0 }
 0x9ce   : > { %v2882_v14 = vpop.f32.mrb[35].mxu0 }
 0xa3e   : > { %v2061_v15 = vpop.f32.mrb[36].mxu0 }
 0xa3f   : > { %2068 = vrot.lane.b32.xlu1 %v2061_v15, %s3472_s3  ;;  %v2893_v16 = vpop.f32.mrb[37].mxu0  ;;  %s3374_s3 = scalar_lea.vmem %s4156_s2, 128 }
 0xa40   : > { %v2064_v17 = vpop.f32.mrb[38].mxu0  ;;  %p3375_p8 = scmp.ne.s32.totalorder %s4156_s2, %s3374_s3 }
 0xa41   : > { %v2894_v18 = vpop.f32.mrb[39].mxu0 }
 0xa42   : > { %p3376_p13 = pnand %p3375_p8, %p4297_p11 }
 0xa44   : > { %p3377_p1 = pneg %p3376_p13 }
 0xa46   : > { %v2175_v20 = vpop.f32.mrb[40].mxu0 }
 0xa47   : > { %2182 = vrot.lane.b32.xlu0 %v2175_v20, %s3473_s13  ;;  %v2905_v21 = vpop.f32.mrb[41].mxu0  ;;  %s3378_s13 = sshll.u32 %s3476_s23, 4  ;;  %s3379_s13 = int_to_ptr.vmem [resolvable:$false] %s3378_s13 }
 0xa48   : > { %v2178_v22 = vpop.f32.mrb[42].mxu0  ;;  %p3381_p0 = scmp.lt.s32.totalorder %s4156_s2, %s3379_s13 }
 0xa49   : > { %v2906_v23 = vpop.f32.mrb[43].mxu0 }
 0xa4e   : > { %v2289_v24 = vpop.f32.mrb[44].mxu0 }
 0xa4f   : > { %2296 = vrot.lane.b32.xlu1 %v2289_v24, %s3474_s28  ;;  %v2917_v25 = vpop.f32.mrb[45].mxu0  ;;  %s3380_s28 = scalar_lea.vmem %s3379_s13, 256 }
 0xa50   : > { %v2292_v26 = vpop.f32.mrb[46].mxu0  ;;  %p3382_p6 = scmp.lt.s32.totalorder %s3380_s28, %s3374_s3 }
 0xa51   : > { %v2918_v27 = vpop.f32.mrb[47].mxu0 }
 0xa52   : > { %p3383_p5 = por %p3382_p6, %p3381_p0 }
 0xa54   : > { %p3384_p9 = pnand %p3383_p5, %p3377_p1 }
 0xab1   : > { %v2069_v28 = vpop.permute.xlu1 %2068 }
 0xab2   : > { %2071 = vst.msk [vmem:[#allocation2] sm:$0xff] %vm1348_vm4, %v2069_v28 }
 0xab9   : > { %v2183_v29 = vpop.permute.xlu0 %2182 }
 0xaba   : > { %2185 = vst.msk [vmem:[#allocation2] sm:$0xff] %vm1463_vm5, %v2183_v29 }
 0xac1   : > { %v2297_v1 = vpop.permute.xlu1 %2296 }
 0xac2   : > { %2299 = vst.msk [vmem:[#allocation2] sm:$0xff] %vm1578_vm6, %v2297_v1 }
 0xac9   : > { %v2300_v30 = vld [vmem:[#allocation2] sm:$0xff] }
 0xaca   : > { %v2301_v31 = vpack.c.bf16 %v2300_v30, %v2300_v30 }
 0xacc   : > { %2924 = vmatmul.mubr.msk.bf16.vlgmr.msra.gmra.mrb[44].mxu1 %vm932_vm1, %v2301_v31 }
 0xb9f   : > { %v2362_v37 = vpop.f32.mrb[44].mxu1 }
 0xba0   : > { %v2363_v40 = vadd.f32 %v2696_v34, %v2362_v37  ;;  %v2925_v41 = vpop.f32.mrb[45].mxu1 }
 0xba1   : > { %v2365_v43 = vpop.f32.mrb[46].mxu1 }
 0xba2   : > { %v2384_v45 = vmul.f32 %v2701_v38, %v2363_v40  ;;  %v2926_v46 = vpop.f32.mrb[47].mxu1 }
 0xba4   : > { %v2385_v12 = vadd.f32 %v2384_v45, %v2376_v44 }
 0xba6   : > { %v2394_v48 = vadd.f32 %v2393_v47, %v2385_v12 }
 0xba8   : > { %v2395_v32 = vsel %vm932_vm1, %v2394_v48, 0.0 }
 0xba9   : > { %2396 = vadd.xlane.f32.xlu0 %v2395_v32 }
 0xc36   : > { %v2397_v51 = vpop.xlane.xlu0 %2396 }
 0xc37   : > { %v2405_v52 = vadd.f32 %v2703_v50, %v2397_v51 }
 0xc39   : > { %v2704_v53 = vmul.f32 -1.442695, %v2405_v52 }
 0xc3b   : > { %3118 = vpow2.f32 %v2704_v53 }
 0xc45   : > { %v3119_v54 = vpop.eup %3118 }
 0xc46   : > { %v2409_v55 = vadd.f32 1.0, %v3119_v54 }
 0xc48   : > { %3120 = vrcp.f32 %v2409_v55 }
 0xc52   : > { %v3121_v56 = vpop.eup %3120 }
 0xc53   : > { %2414 = vperm.xlu1 %3066, %v3121_v56   ;;  %v2418_v57 = vsub.f32 1.0, %v3121_v56 }
 0xc57   : > { %2421 = vperm.xlu1 %3066, %v2418_v57  }
 0xcd2   : > { %v2415_v58 = vpop.permute.xlu1 %2414 }
 0xcd3   : > { %v2417_v60 = vmul.f32 %v2415_v58, %v1643_v36 }
 0xcd6   : > { %v2422_v59 = vpop.permute.xlu1 %2421 }
 0xcd7   : > { %v2424_v61 = vmul.f32 %v2422_v59, %v2363_v40 }
 0xcd9   : > { %v2425_v62 = vadd.f32 %v2424_v61, %v2417_v60 }
 0xcdb   : > { %2426 = vst.msk [vmem:[%s884_s7] sm:$0xff] %vm932_vm1, %v2425_v62 }
 0xcdc   : > { %3387 = shalt.err (!%p3384_p9)
}
 0xcdd   : > { %s3388_s9 = scalar_lea.hbm %s4154_s30, 128  ;;  %s3392_s26 = scalar_lea.hbm %s4296_s8, 256 }
 0xcde   : > { %p3389_p12 = scmp.ne.s32.totalorder %s4154_s30, %s3388_s9  ;;  %p3393_p3 = scmp.lt.u32.totalorder %s4154_s30, %s4296_s8 }
 0xcdf   : > { %p3394_p4 = scmp.lt.u32.totalorder %s3392_s26, %s3388_s9  ;;  %p3396_p8 = scmp.lt.u32.totalorder %s3388_s9, %s4154_s30 }
 0xce0   : > { %p3390_p10 = pnand %p3389_p12, %p4297_p11 }
 0xce1   : > { %p3395_p7 = por %p3394_p4, %p3393_p3 }
 0xce2   : > { %p3391_p2 = pneg %p3390_p10 }
 0xce3   : > { %p3397_p13 = por %p3396_p8, %p3395_p7 }
 0xce5   : > { %p3398_p1 = pnand %p3397_p13, %p3391_p2 }
 0xce7   : > { %3401 = shalt.err (!%p3398_p1)
}
 0xce8   : > { %2963 = dma.vmem_to_hbm [thread:$0]  (%p4297_p11), %s4156_s2, 128, %s4154_s30, %s2428_s24  }
 0xce9 PF: > { %s4298_s0 = sld [smem:[#allocation29_spill]]  ;;  %s4299_s5 = sld [smem:[#allocation26_spill]] }
 0xcea   : > { %s4300_s3 = sld [smem:[#allocation33_spill]] }
 0xcef   : > { %p3015_p0 = scmp.ge.s32.totalorder %s4298_s0, 2  ;;  %s2453_s23 = sand.u32 1, %s4299_s5  }
 0xcf0   : > { %p4301_p6 = scmp.ne.s32.totalorder %s4300_s3, 0  ;;  %s2454_s13 = scalar_lea.sflag [#allocation6], %s2453_s23 }
 0xcf2   : > { %p2994_p5 = pnand %p3015_p0, %p4301_p6 }
 0xcf4   : > { %3439 = dma.done.wait (!%p2994_p5), %s2454_s13, 128  }
 0xcf5   : > { %3441 = vsyncadd (!%p2994_p5), %s2454_s13, 4294967168  ;;  %s4302_s2 = sld [smem:[#allocation30_spill]]  ;;  %s4303_s27 = sld [smem:[#allocation27_spill]] }
 0xcf6   : > { %s4304_s28 = sld [smem:[#allocation28_spill]]  ;;  %s4305_s6 = sld [smem:[#allocation31_spill]] }
 0xcfb   : > { %p41_p9 = scmp.ge.s32.totalorder %s4302_s2, 4  }
 0xcfd   :  { %43 = sbr.rel (!%p41_p9) target bundleno = 22 (0x16), region = 197 }
 0xd04   :  { %2459 = vsyncpa [#allocation5], 1 }
 0xd05   :  { %2461 = vsyncpa [#allocation5 + $0x1], 1 }
 0xd06   :  { %2462 = vsyncpa [#allocation8], 1 }
 0xd07   :  { %2463 = vsyncpa [#allocation11], 1 }
 0xd08   :  { %2464 = vsyncpa [#allocation14], 1 }
 0xd09   :  { %2465 = vsyncpa [#allocation17], 1 }
 0xd0a   :  { %2466 = vsyncpa [#allocation6], 1 }
 0xd0b   :  { %2468 = vsyncpa [#allocation6 + $0x1], 1 }

</bundles_post_ra>
